<compile_context>
chip_gen: v7x
topology: tpu7x:2x2x1
jax: 0.10.0
libtpu: 0.0.40
codegen_flags: <defaults>
</compile_context>

<pallas_src>
import functools
import math

import jax
import jax.numpy as jnp
from jax.experimental import pallas as pl
from jax.experimental.pallas import tpu as pltpu

NEG_INF = -1e30   # additive mask value (large negative, avoids inf-inf NaNs)
LN_EPS = 1e-5     # PyTorch LayerNorm default

# Packed small-parameter row indices (per layer).
_R_BQ, _R_BK, _R_BV, _R_BO = 0, 1, 2, 3
_R_LN1W, _R_LN1B = 4, 5
_R_B1, _R_B2 = 6, 7
_R_LN2W, _R_LN2B = 8, 9
_N_SMALL_ROWS = 10


def _layer_norm(x, w, b, eps=LN_EPS):
    mu = jnp.mean(x, axis=-1, keepdims=True)
    var = jnp.mean(jnp.square(x - mu), axis=-1, keepdims=True)
    return (x - mu) * jax.lax.rsqrt(var + eps) * w + b


def _erf(x):
    # Abramowitz & Stegun 7.1.26 polynomial, |abs error| < 1.5e-7.  Built from
    # exp / where / mul only so it lowers on any Mosaic version (no reliance on
    # a native erf lowering); numerically matches PyTorch's exact-erf gelu far
    # inside the bf16 matmul tolerance.
    a1, a2, a3, a4, a5 = (0.254829592, -0.284496736, 1.421413741,
                          -1.453152027, 1.061405429)
    p = 0.3275911
    s = jnp.where(x < 0.0, -1.0, 1.0)
    ax = jnp.abs(x)
    t = 1.0 / (1.0 + p * ax)
    poly = ((((a5 * t + a4) * t + a3) * t + a2) * t + a1) * t
    return s * (1.0 - poly * jnp.exp(-ax * ax))


def _gelu_exact(x):
    # PyTorch F.gelu default (erf form).
    return 0.5 * x * (1.0 + _erf(x * 0.7071067811865476))


def _transformer_kernel(nhead,
                        x_ref, mask_ref, pad_ref,
                        wqkv_ref, wo_ref, w1_ref, w2_ref,
                        small_ref, fn_ref,
                        out_ref, mask_sc):
    """One grid step = one batch tile x one encoder layer."""
    l = pl.program_id(1)
    num_l = pl.num_programs(1)

    TB, S, E = out_ref.shape
    H = nhead
    D = E // H
    F = w1_ref.shape[-1]

    # ---- once per batch tile: load activation, build combined additive mask
    @pl.when(l == 0)
    def _():
        out_ref[...] = x_ref[...]
        mask_sc[...] = mask_ref[...][None, :, :] + pad_ref[...]    # (TB, S, S)

    x2d = out_ref[...].reshape(TB * S, E)        # layer-resident activation (f32)
    x_bf = x2d.astype(jnp.bfloat16)

    # ---- packed per-layer small params (one DMA per layer) ------------------
    sp = small_ref[0]                            # (10, max(E, F)) f32
    bq, bk, bv = sp[0:1, :E], sp[1:2, :E], sp[2:3, :E]
    bo = sp[3:4, :E]
    ln1w, ln1b = sp[4:5, :E], sp[5:6, :E]
    b1 = sp[6:7, :F]
    b2 = sp[7:8, :E]
    ln2w, ln2b = sp[8:9, :E], sp[9:10, :E]

    # ---- fused QKV projection (1/sqrt(D) pre-folded into Q weights/bias) ----
    qkv = jnp.dot(x_bf, wqkv_ref[0], preferred_element_type=jnp.float32)  # (TB*S, 3E)
    q_bf = (qkv[:, :E] + bq).reshape(TB, S, E).astype(jnp.bfloat16)
    k_bf = (qkv[:, E:2 * E] + bk).reshape(TB, S, E).astype(jnp.bfloat16)
    v_bf = (qkv[:, 2 * E:] + bv).reshape(TB, S, E).astype(jnp.bfloat16)

    add_mask = mask_sc[...]                                               # (TB, S, S)
    wo = wo_ref[0]                                                        # (E, E) bf16

    # ---- multi-head attention ------------------------------------------------
    # Static per-head loop (lowering-safe: no 4-D sublane transposes).
    def head_ctx(h):
        lo = h * D
        qh = q_bf[:, :, lo:lo + D]
        kh = k_bf[:, :, lo:lo + D]
        vh = v_bf[:, :, lo:lo + D]
        scores = jnp.einsum('bqd,bkd->bqk', qh, kh,
                            preferred_element_type=jnp.float32) + add_mask
        m = jnp.max(scores, axis=-1, keepdims=True)
        p = jnp.exp(scores - m)
        denom = jnp.sum(p, axis=-1, keepdims=True)
        attn = p * pl.reciprocal(denom, approx=True)
        return jnp.einsum('bqk,bkd->bqd', attn.astype(jnp.bfloat16), vh,
                          preferred_element_type=jnp.float32)             # (TB, S, D)

    if D % 128 == 0:
        # Lane-aligned heads: concat once, single fully-fed (TB*S,E)@(E,E) matmul.
        ctx_all = jnp.concatenate(
            [head_ctx(h).astype(jnp.bfloat16) for h in range(H)],
            axis=-1).reshape(TB * S, E)
        attn_out = jnp.dot(ctx_all, wo, preferred_element_type=jnp.float32) + bo
    else:
        # Small / unaligned head_dim: accumulate the output projection per head
        # (one live f32 accumulator; avoids unaligned lane concat).
        attn_out = None
        for h in range(H):
            ctx2 = head_ctx(h).reshape(TB * S, D).astype(jnp.bfloat16)
            part = jnp.dot(ctx2, wo[h * D:(h + 1) * D, :],
                           preferred_element_type=jnp.float32)
            attn_out = part if attn_out is None else attn_out + part
        attn_out = attn_out + bo

    # residual + norm1 (post-norm; dropout = identity at inference)
    y = _layer_norm(x2d + attn_out, ln1w, ln1b)

    # ---- feed-forward --------------------------------------------------------
    h1 = jnp.dot(y.astype(jnp.bfloat16), w1_ref[0],
                 preferred_element_type=jnp.float32) + b1
    h1 = _gelu_exact(h1)
    ff = jnp.dot(h1.astype(jnp.bfloat16), w2_ref[0],
                 preferred_element_type=jnp.float32) + b2

    # residual + norm2
    y2 = _layer_norm(y + ff, ln2w, ln2b)

    # keep resident in out_ref for the next layer, or apply the final encoder
    # LayerNorm and emit on the last layer.
    @pl.when(l < num_l - 1)
    def _():
        out_ref[...] = y2.reshape(TB, S, E)

    @pl.when(l == num_l - 1)
    def _():
        out_ref[...] = _layer_norm(y2, fn_ref[0:1, :], fn_ref[1:2, :]).reshape(TB, S, E)


def _vmem_capacity_bytes():
    try:
        return int(pltpu.get_tpu_info().vmem_capacity_bytes)
    except Exception:
        return 64 << 20          # conservative fallback (v7x per-TC size)


def _choose_batch_tile(N, S, E, F, vmem_cap_bytes):
    """Generation-aware batch tile.

    v5e/v6e (>=100 MiB VMEM, one TC): prefer NB == 1 so each layer's weights
    are streamed exactly once, with a large row cap.  v7x (64 MiB per TC, two
    TCs): target NB == 2 (one tile per core) with a tighter budget.
    """
    single_core = vmem_cap_bytes >= (100 << 20)
    min_tiles = 1 if single_core else 2
    row_cap = 4096 if single_core else 1024
    budget = int(vmem_cap_bytes * 0.55)
    weight_bytes = 2 * 2 * (3 * E * E + E * E + 2 * E * F)   # dbl-buffered bf16

    def act_bytes(tb):
        rows = tb * S
        return 4 * (2 * tb * S * E            # input block + resident out block
                    + 2 * tb * S * S          # mask scratch + live score block
                    + rows * (3 * E + F + 2 * E))   # qkv / ff-hidden / temps

    best = 1
    for cand in range(1, N + 1):
        if N % cand:
            continue
        if cand * S > row_cap:
            continue
        if (N // cand) < min_tiles:
            continue
        if weight_bytes + act_bytes(cand) > budget:
            continue
        best = max(best, cand)
    # TODO(synk): for very large models, weight_bytes alone may exceed the
    # budget -> would need K-tiling of the per-layer weights (not needed here).
    return best


def transformer_forward(params, src, src_mask, src_padding_mask):
    """Equivalent of Transformer.forward.

    src:               (S, N, E) float32   (PyTorch seq-first layout)
    src_mask:          (S, S)    float32   additive attention mask
    src_padding_mask:  (N, S)    bool      True = position is padding (ignored)
    returns:           (S, N, E) float32
    """
    S, N, E = src.shape
    nhead = params["nhead"]
    assert E % nhead == 0
    F = params["w1t"].shape[-1]
    L = params["wqkv"].shape[0]

    x = jnp.transpose(src, (1, 0, 2)).astype(jnp.float32)              # (N, S, E)
    pad_bias = jnp.where(src_padding_mask, NEG_INF, 0.0).astype(jnp.float32)
    pad_bias = pad_bias[:, None, :]                                     # (N, 1, S)
    attn_mask = src_mask.astype(jnp.float32)

    vmem_cap = _vmem_capacity_bytes()
    TB = _choose_batch_tile(N, S, E, F, vmem_cap)
    NB = N // TB
    vmem_limit = max(32 << 20, min(int(vmem_cap * 0.75), 112 << 20))

    kernel = functools.partial(_transformer_kernel, nhead)

    def w_spec(shape):          # per-layer stacked tensor, streamed over layer axis
        nd = len(shape)
        return pl.BlockSpec((1,) + tuple(shape[1:]),
                            lambda b, l, _n=nd: (l,) + (0,) * (_n - 1))

    def const_spec(shape):      # small constant array, fetched once
        nd = len(shape)
        return pl.BlockSpec(tuple(shape), lambda b, l, _n=nd: (0,) * _n)

    in_specs = [
        pl.BlockSpec((TB, S, E), lambda b, l: (b, 0, 0)),     # x
        const_spec(attn_mask.shape),                          # attn mask (S, S)
        pl.BlockSpec((TB, 1, S), lambda b, l: (b, 0, 0)),     # key-padding bias
        w_spec(params["wqkv"].shape),                         # (L, E, 3E) bf16
        w_spec(params["wo"].shape),                           # (L, E, E)  bf16
        w_spec(params["w1t"].shape),                          # (L, E, F)  bf16
        w_spec(params["w2t"].shape),                          # (L, F, E)  bf16
        w_spec(params["small"].shape),                        # (L, 10, W) f32
        const_spec(params["norm"].shape),                     # (2, E)     f32
    ]
    # TODO(synk): for long sequences on v7x, add flash-style query tiling (extra
    # grid axis over S_q with online softmax) so the (S, S) score / mask blocks
    # stay bounded; unnecessary at these shapes.
    # TODO(synk): on v6e there is headroom to sweep pipeline_mode=pl.Buffered(3)
    # on the large streamed weight specs (wqkv / w1t / w2t).

    out = pl.pallas_call(
        kernel,
        out_shape=jax.ShapeDtypeStruct((N, S, E), jnp.float32),
        grid=(NB, L),
        in_specs=in_specs,
        out_specs=pl.BlockSpec((TB, S, E), lambda b, l: (b, 0, 0)),
        scratch_shapes=[pltpu.VMEM((TB, S, S), jnp.float32)],   # combined mask
        compiler_params=pltpu.CompilerParams(
            dimension_semantics=("parallel", "arbitrary"),
            vmem_limit_bytes=vmem_limit,
        ),
    )(x, attn_mask, pad_bias,
      params["wqkv"], params["wo"], params["w1t"], params["w2t"],
      params["small"], params["norm"])

    return jnp.transpose(out, (1, 0, 2))                               # (S, N, E)


def init_params(key, num_layers, nhead, dim_feedforward, d_input):
    """Random params in the stacked / pre-transposed layout the kernel expects."""
    E, F, L, H = d_input, dim_feedforward, num_layers, nhead
    D = E // H
    scale = 1.0 / math.sqrt(D)
    W = max(E, F)

    def row(v):
        v = v.astype(jnp.float32)
        return jnp.pad(v, (0, W - v.shape[0]))

    wqkv, wo, w1t, w2t, small = [], [], [], [], []
    for _ in range(L):
        key, *ks = jax.random.split(key, 9)
        in_proj_w = jax.random.normal(ks[0], (3 * E, E), jnp.float32) * 0.05
        in_proj_b = jax.random.normal(ks[1], (3 * E,), jnp.float32) * 0.05
        out_proj_w = jax.random.normal(ks[2], (E, E), jnp.float32) * 0.05
        out_proj_b = jax.random.normal(ks[3], (E,), jnp.float32) * 0.05
        lin1_w = jax.random.normal(ks[4], (F, E), jnp.float32) * 0.05
        lin1_b = jax.random.normal(ks[5], (F,), jnp.float32) * 0.05
        lin2_w = jax.random.normal(ks[6], (E, F), jnp.float32) * 0.05
        lin2_b = jax.random.normal(ks[7], (E,), jnp.float32) * 0.05

        w = in_proj_w.T                              # (E, 3E): x @ W -> [q|k|v]
        w = w.at[:, :E].multiply(scale)              # fold 1/sqrt(D) into Q cols
        wqkv.append(w)
        wo.append(out_proj_w.T)                      # (E, E)
        w1t.append(lin1_w.T)                         # (E, F)
        w2t.append(lin2_w.T)                         # (F, E)

        small.append(jnp.stack([
            row(in_proj_b[:E] * scale),              # bq (pre-scaled)
            row(in_proj_b[E:2 * E]),                 # bk
            row(in_proj_b[2 * E:]),                  # bv
            row(out_proj_b),                         # bo
            row(jnp.ones((E,))), row(jnp.zeros((E,))),   # ln1 w / b
            row(lin1_b),                             # b1
            row(lin2_b),                             # b2
            row(jnp.ones((E,))), row(jnp.zeros((E,))),   # ln2 w / b
        ]))                                          # (10, W)

    return dict(
        nhead=nhead,
        wqkv=jnp.stack(wqkv).astype(jnp.bfloat16),
        wo=jnp.stack(wo).astype(jnp.bfloat16),
        w1t=jnp.stack(w1t).astype(jnp.bfloat16),
        w2t=jnp.stack(w2t).astype(jnp.bfloat16),
        small=jnp.stack(small).astype(jnp.float32),                     # (L,10,W)
        norm=jnp.stack([jnp.ones((E,)), jnp.zeros((E,))]).astype(jnp.float32),
    )


if __name__ == "__main__":
    # Small, module-consistent shapes
    NUM_LAYERS, NHEAD, DIM_FF, D_INPUT = 2, 4, 64, 32
    S, N = 8, 2

    key = jax.random.PRNGKey(0)
    k_param, k_in = jax.random.split(key)
    params = init_params(k_param, NUM_LAYERS, NHEAD, DIM_FF, D_INPUT)

    src = jax.random.normal(k_in, (S, N, D_INPUT), jnp.float32)

    # causal additive float mask (like generate_square_subsequent_mask)
    idx = jnp.arange(S)
    src_mask = jnp.where(idx[None, :] > idx[:, None], NEG_INF, 0.0).astype(jnp.float32)

    # padding mask: batch 0 unpadded, batch 1 has last 2 positions padded
    src_padding_mask = jnp.zeros((N, S), bool).at[1, S - 2:].set(True)

    # TODO(synk): dropout layers are treated as identity (inference mode).
    out = transformer_forward(params, src, src_mask, src_padding_mask)
    out = jax.block_until_ready(out)

    assert out.shape == (S, N, D_INPUT)
    assert bool(jnp.all(jnp.isfinite(out)))
    print("KERNEL_OK")
</pallas_src>

<mosaic_0001>
module attributes {stable_mosaic.version = 11 : i64} {
  func.func @_transformer_kernel(%arg0: i32, %arg1: i32, %arg2: memref<1x8x32xf32, #tpu.memory_space<vmem>>, %arg3: memref<8x8xf32, #tpu.memory_space<vmem>>, %arg4: memref<1x1x8xf32, #tpu.memory_space<vmem>>, %arg5: memref<1x32x96xbf16, #tpu.memory_space<vmem>>, %arg6: memref<1x32x32xbf16, #tpu.memory_space<vmem>>, %arg7: memref<1x32x64xbf16, #tpu.memory_space<vmem>>, %arg8: memref<1x64x32xbf16, #tpu.memory_space<vmem>>, %arg9: memref<1x10x64xf32, #tpu.memory_space<vmem>>, %arg10: memref<2x32xf32, #tpu.memory_space<vmem>>, %arg11: memref<1x8x32xf32, #tpu.memory_space<vmem>>, %arg12: memref<1x8x8xf32, #tpu.memory_space<vmem>>) attributes {dimension_semantics = [#tpu.dimension_semantics<parallel>, #tpu.dimension_semantics<arbitrary>], iteration_bounds = array<i64: 2, 2>, scalar_prefetch = 0 : i64, scratch_operands = 1 : i64, tpu.core_type = #tpu.core_type<tc>, window_params = [{transform_indices = @transform_0, window_bounds = array<i64: 1, 8, 32>}, {pipeline_mode = #tpu.pipeline_mode<synchronous>, transform_indices = @transform_1, window_bounds = array<i64: 8, 8>}, {transform_indices = @transform_2, window_bounds = array<i64: 1, 1, 8>}, {transform_indices = @transform_3, window_bounds = array<i64: 1, 32, 96>}, {transform_indices = @transform_4, window_bounds = array<i64: 1, 32, 32>}, {transform_indices = @transform_5, window_bounds = array<i64: 1, 32, 64>}, {transform_indices = @transform_6, window_bounds = array<i64: 1, 64, 32>}, {transform_indices = @transform_7, window_bounds = array<i64: 1, 10, 64>}, {pipeline_mode = #tpu.pipeline_mode<synchronous>, transform_indices = @transform_8, window_bounds = array<i64: 2, 32>}, {transform_indices = @transform_9, window_bounds = array<i64: 1, 8, 32>}]} {
    %c0_i32 = arith.constant 0 : i32
    %0 = arith.cmpi eq, %arg1, %c0_i32 : i32
    %1 = arith.extui %0 : i1 to i32
    %c0_i32_0 = arith.constant 0 : i32
    %2 = arith.cmpi ne, %1, %c0_i32_0 : i32
    scf.if %2 {
      %c0_72 = arith.constant 0 : index
      %c0_73 = arith.constant 0 : index
      %c0_74 = arith.constant 0 : index
      %233 = vector.load %arg2[%c0_72, %c0_73, %c0_74] : memref<1x8x32xf32, #tpu.memory_space<vmem>>, vector<1x8x32xf32>
      %c0_75 = arith.constant 0 : index
      %c0_76 = arith.constant 0 : index
      %c0_77 = arith.constant 0 : index
      %234 = vector.load %arg11[%c0_75, %c0_76, %c0_77] : memref<1x8x32xf32, #tpu.memory_space<vmem>>, vector<1x8x32xf32>
      tpu.vector_store %arg11[%c0_75, %c0_76, %c0_77], %233 {strides = array<i32>} : memref<1x8x32xf32, #tpu.memory_space<vmem>>, vector<1x8x32xf32>,
      %c0_78 = arith.constant 0 : index
      %c0_79 = arith.constant 0 : index
      %235 = vector.load %arg3[%c0_78, %c0_79] : memref<8x8xf32, #tpu.memory_space<vmem>>, vector<8x8xf32>
      %236 = vector.shape_cast %235 : vector<8x8xf32> to vector<1x8x8xf32>
      %c0_80 = arith.constant 0 : index
      %c0_81 = arith.constant 0 : index
      %c0_82 = arith.constant 0 : index
      %237 = vector.load %arg4[%c0_80, %c0_81, %c0_82] : memref<1x1x8xf32, #tpu.memory_space<vmem>>, vector<1x1x8xf32>
      %238 = vector.broadcast %237 : vector<1x1x8xf32> to vector<1x8x8xf32>
      %239 = arith.addf %236, %238 : vector<1x8x8xf32>
      %c0_83 = arith.constant 0 : index
      %c0_84 = arith.constant 0 : index
      %c0_85 = arith.constant 0 : index
      %240 = vector.load %arg12[%c0_83, %c0_84, %c0_85] : memref<1x8x8xf32, #tpu.memory_space<vmem>>, vector<1x8x8xf32>
      tpu.vector_store %arg12[%c0_83, %c0_84, %c0_85], %239 {strides = array<i32>} : memref<1x8x8xf32, #tpu.memory_space<vmem>>, vector<1x8x8xf32>,
    } else {
    }
    %c0 = arith.constant 0 : index
    %c0_1 = arith.constant 0 : index
    %c0_2 = arith.constant 0 : index
    %3 = vector.load %arg11[%c0, %c0_1, %c0_2] : memref<1x8x32xf32, #tpu.memory_space<vmem>>, vector<1x8x32xf32>
    %4 = vector.shape_cast %3 : vector<1x8x32xf32> to vector<8x32xf32>
    %5 = arith.truncf %4 : vector<8x32xf32> to vector<8x32xbf16>
    %c0_3 = arith.constant 0 : index
    %c0_4 = arith.constant 0 : index
    %c0_5 = arith.constant 0 : index
    %6 = vector.load %arg9[%c0_3, %c0_4, %c0_5] : memref<1x10x64xf32, #tpu.memory_space<vmem>>, vector<1x10x64xf32>
    %7 = vector.shape_cast %6 : vector<1x10x64xf32> to vector<10x64xf32>
    %8 = vector.extract_strided_slice %7 {offsets = [0, 0], sizes = [1, 32], strides = [1, 1]} : vector<10x64xf32> to vector<1x32xf32>
    %9 = vector.extract_strided_slice %7 {offsets = [1, 0], sizes = [1, 32], strides = [1, 1]} : vector<10x64xf32> to vector<1x32xf32>
    %10 = vector.extract_strided_slice %7 {offsets = [2, 0], sizes = [1, 32], strides = [1, 1]} : vector<10x64xf32> to vector<1x32xf32>
    %11 = vector.extract_strided_slice %7 {offsets = [3, 0], sizes = [1, 32], strides = [1, 1]} : vector<10x64xf32> to vector<1x32xf32>
    %12 = vector.extract_strided_slice %7 {offsets = [4, 0], sizes = [1, 32], strides = [1, 1]} : vector<10x64xf32> to vector<1x32xf32>
    %13 = vector.extract_strided_slice %7 {offsets = [5, 0], sizes = [1, 32], strides = [1, 1]} : vector<10x64xf32> to vector<1x32xf32>
    %14 = vector.extract_strided_slice %7 {offsets = [6, 0], sizes = [1, 64], strides = [1, 1]} : vector<10x64xf32> to vector<1x64xf32>
    %15 = vector.extract_strided_slice %7 {offsets = [7, 0], sizes = [1, 32], strides = [1, 1]} : vector<10x64xf32> to vector<1x32xf32>
    %16 = vector.extract_strided_slice %7 {offsets = [8, 0], sizes = [1, 32], strides = [1, 1]} : vector<10x64xf32> to vector<1x32xf32>
    %17 = vector.extract_strided_slice %7 {offsets = [9, 0], sizes = [1, 32], strides = [1, 1]} : vector<10x64xf32> to vector<1x32xf32>
    %c0_6 = arith.constant 0 : index
    %c0_7 = arith.constant 0 : index
    %c0_8 = arith.constant 0 : index
    %18 = vector.load %arg5[%c0_6, %c0_7, %c0_8] : memref<1x32x96xbf16, #tpu.memory_space<vmem>>, vector<1x32x96xbf16>
    %19 = vector.shape_cast %18 : vector<1x32x96xbf16> to vector<32x96xbf16>
    %cst = arith.constant dense<0.000000e+00> : vector<8x96xf32>
    %20 = tpu.matmul %5, %19, %cst {dimension_numbers = #tpu.dot_dimension_numbers<[1], [0], [0], [1], [0, 0, 1, 1], [], []>} : vector<8x32xbf16>, vector<32x96xbf16>, vector<8x96xf32> -> vector<8x96xf32>
    %21 = vector.extract_strided_slice %20 {offsets = [0, 0], sizes = [8, 32], strides = [1, 1]} : vector<8x96xf32> to vector<8x32xf32>
    %22 = vector.broadcast %8 : vector<1x32xf32> to vector<8x32xf32>
    %23 = arith.addf %21, %22 : vector<8x32xf32>
    %24 = vector.shape_cast %23 : vector<8x32xf32> to vector<1x8x32xf32>
    %25 = arith.truncf %24 : vector<1x8x32xf32> to vector<1x8x32xbf16>
    %26 = vector.extract_strided_slice %20 {offsets = [0, 32], sizes = [8, 32], strides = [1, 1]} : vector<8x96xf32> to vector<8x32xf32>
    %27 = vector.broadcast %9 : vector<1x32xf32> to vector<8x32xf32>
    %28 = arith.addf %26, %27 : vector<8x32xf32>
    %29 = vector.shape_cast %28 : vector<8x32xf32> to vector<1x8x32xf32>
    %30 = arith.truncf %29 : vector<1x8x32xf32> to vector<1x8x32xbf16>
    %31 = vector.extract_strided_slice %20 {offsets = [0, 64], sizes = [8, 32], strides = [1, 1]} : vector<8x96xf32> to vector<8x32xf32>
    %32 = vector.broadcast %10 : vector<1x32xf32> to vector<8x32xf32>
    %33 = arith.addf %31, %32 : vector<8x32xf32>
    %34 = vector.shape_cast %33 : vector<8x32xf32> to vector<1x8x32xf32>
    %35 = arith.truncf %34 : vector<1x8x32xf32> to vector<1x8x32xbf16>
    %c0_9 = arith.constant 0 : index
    %c0_10 = arith.constant 0 : index
    %c0_11 = arith.constant 0 : index
    %36 = vector.load %arg12[%c0_9, %c0_10, %c0_11] : memref<1x8x8xf32, #tpu.memory_space<vmem>>, vector<1x8x8xf32>
    %c0_12 = arith.constant 0 : index
    %c0_13 = arith.constant 0 : index
    %c0_14 = arith.constant 0 : index
    %37 = vector.load %arg6[%c0_12, %c0_13, %c0_14] : memref<1x32x32xbf16, #tpu.memory_space<vmem>>, vector<1x32x32xbf16>
    %38 = vector.shape_cast %37 : vector<1x32x32xbf16> to vector<32x32xbf16>
    %39 = vector.extract_strided_slice %25 {offsets = [0, 0, 0], sizes = [1, 8, 8], strides = [1, 1, 1]} : vector<1x8x32xbf16> to vector<1x8x8xbf16>
    %40 = vector.extract_strided_slice %30 {offsets = [0, 0, 0], sizes = [1, 8, 8], strides = [1, 1, 1]} : vector<1x8x32xbf16> to vector<1x8x8xbf16>
    %41 = vector.extract_strided_slice %35 {offsets = [0, 0, 0], sizes = [1, 8, 8], strides = [1, 1, 1]} : vector<1x8x32xbf16> to vector<1x8x8xbf16>
    "tpu.trace_start"() <{level = 10 : i32, message = "bqd,bkd->bqk"}> : () -> ()
    %cst_15 = arith.constant dense<0.000000e+00> : vector<1x8x8xf32>
    %42 = tpu.matmul %39, %40, %cst_15 {dimension_numbers = #tpu.dot_dimension_numbers<[2], [2], [1], [1], [0, 0, 0, 1, 1, 1], [0], [0]>} : vector<1x8x8xbf16>, vector<1x8x8xbf16>, vector<1x8x8xf32> -> vector<1x8x8xf32>
    "tpu.trace_stop"() : () -> ()
    %43 = arith.addf %42, %36 : vector<1x8x8xf32>
    %cst_16 = arith.constant dense<0xFF800000> : vector<1x8xf32>
    %44 = vector.multi_reduction <maximumf>, %43, %cst_16 [2] : vector<1x8x8xf32> to vector<1x8xf32>
    %45 = vector.shape_cast %44 : vector<1x8xf32> to vector<1x8x1xf32>
    %46 = vector.broadcast %45 : vector<1x8x1xf32> to vector<1x8x8xf32>
    %47 = arith.subf %43, %46 : vector<1x8x8xf32>
    %48 = math.exp %47 : vector<1x8x8xf32>
    %cst_17 = arith.constant dense<0.000000e+00> : vector<1x8xf32>
    %49 = vector.multi_reduction <add>, %48, %cst_17 [2] : vector<1x8x8xf32> to vector<1x8xf32>
    %50 = vector.shape_cast %49 : vector<1x8xf32> to vector<1x8x1xf32>
    %51 = tpu.reciprocal %50 {approx = true} : vector<1x8x1xf32> -> vector<1x8x1xf32>
    %52 = vector.broadcast %51 : vector<1x8x1xf32> to vector<1x8x8xf32>
    %53 = arith.mulf %48, %52 : vector<1x8x8xf32>
    %54 = arith.truncf %53 : vector<1x8x8xf32> to vector<1x8x8xbf16>
    "tpu.trace_start"() <{level = 10 : i32, message = "bqk,bkd->bqd"}> : () -> ()
    %cst_18 = arith.constant dense<0.000000e+00> : vector<1x8x8xf32>
    %55 = tpu.matmul %54, %41, %cst_18 {dimension_numbers = #tpu.dot_dimension_numbers<[2], [1], [1], [2], [0, 0, 0, 1, 1, 2], [0], [0]>} : vector<1x8x8xbf16>, vector<1x8x8xbf16>, vector<1x8x8xf32> -> vector<1x8x8xf32>
    "tpu.trace_stop"() : () -> ()
    %56 = vector.shape_cast %55 : vector<1x8x8xf32> to vector<8x8xf32>
    %57 = arith.truncf %56 : vector<8x8xf32> to vector<8x8xbf16>
    %58 = vector.extract_strided_slice %38 {offsets = [0, 0], sizes = [8, 32], strides = [1, 1]} : vector<32x32xbf16> to vector<8x32xbf16>
    %cst_19 = arith.constant dense<0.000000e+00> : vector<8x32xf32>
    %59 = tpu.matmul %57, %58, %cst_19 {dimension_numbers = #tpu.dot_dimension_numbers<[1], [0], [0], [1], [0, 0, 1, 1], [], []>} : vector<8x8xbf16>, vector<8x32xbf16>, vector<8x32xf32> -> vector<8x32xf32>
    %60 = vector.extract_strided_slice %25 {offsets = [0, 0, 8], sizes = [1, 8, 8], strides = [1, 1, 1]} : vector<1x8x32xbf16> to vector<1x8x8xbf16>
    %61 = vector.extract_strided_slice %30 {offsets = [0, 0, 8], sizes = [1, 8, 8], strides = [1, 1, 1]} : vector<1x8x32xbf16> to vector<1x8x8xbf16>
    %62 = vector.extract_strided_slice %35 {offsets = [0, 0, 8], sizes = [1, 8, 8], strides = [1, 1, 1]} : vector<1x8x32xbf16> to vector<1x8x8xbf16>
    "tpu.trace_start"() <{level = 10 : i32, message = "bqd,bkd->bqk"}> : () -> ()
    %cst_20 = arith.constant dense<0.000000e+00> : vector<1x8x8xf32>
    %63 = tpu.matmul %60, %61, %cst_20 {dimension_numbers = #tpu.dot_dimension_numbers<[2], [2], [1], [1], [0, 0, 0, 1, 1, 1], [0], [0]>} : vector<1x8x8xbf16>, vector<1x8x8xbf16>, vector<1x8x8xf32> -> vector<1x8x8xf32>
    "tpu.trace_stop"() : () -> ()
    %64 = arith.addf %63, %36 : vector<1x8x8xf32>
    %cst_21 = arith.constant dense<0xFF800000> : vector<1x8xf32>
    %65 = vector.multi_reduction <maximumf>, %64, %cst_21 [2] : vector<1x8x8xf32> to vector<1x8xf32>
    %66 = vector.shape_cast %65 : vector<1x8xf32> to vector<1x8x1xf32>
    %67 = vector.broadcast %66 : vector<1x8x1xf32> to vector<1x8x8xf32>
    %68 = arith.subf %64, %67 : vector<1x8x8xf32>
    %69 = math.exp %68 : vector<1x8x8xf32>
    %cst_22 = arith.constant dense<0.000000e+00> : vector<1x8xf32>
    %70 = vector.multi_reduction <add>, %69, %cst_22 [2] : vector<1x8x8xf32> to vector<1x8xf32>
    %71 = vector.shape_cast %70 : vector<1x8xf32> to vector<1x8x1xf32>
    %72 = tpu.reciprocal %71 {approx = true} : vector<1x8x1xf32> -> vector<1x8x1xf32>
    %73 = vector.broadcast %72 : vector<1x8x1xf32> to vector<1x8x8xf32>
    %74 = arith.mulf %69, %73 : vector<1x8x8xf32>
    %75 = arith.truncf %74 : vector<1x8x8xf32> to vector<1x8x8xbf16>
    "tpu.trace_start"() <{level = 10 : i32, message = "bqk,bkd->bqd"}> : () -> ()
    %cst_23 = arith.constant dense<0.000000e+00> : vector<1x8x8xf32>
    %76 = tpu.matmul %75, %62, %cst_23 {dimension_numbers = #tpu.dot_dimension_numbers<[2], [1], [1], [2], [0, 0, 0, 1, 1, 2], [0], [0]>} : vector<1x8x8xbf16>, vector<1x8x8xbf16>, vector<1x8x8xf32> -> vector<1x8x8xf32>
    "tpu.trace_stop"() : () -> ()
    %77 = vector.shape_cast %76 : vector<1x8x8xf32> to vector<8x8xf32>
    %78 = arith.truncf %77 : vector<8x8xf32> to vector<8x8xbf16>
    %79 = vector.extract_strided_slice %38 {offsets = [8, 0], sizes = [8, 32], strides = [1, 1]} : vector<32x32xbf16> to vector<8x32xbf16>
    %cst_24 = arith.constant dense<0.000000e+00> : vector<8x32xf32>
    %80 = tpu.matmul %78, %79, %cst_24 {dimension_numbers = #tpu.dot_dimension_numbers<[1], [0], [0], [1], [0, 0, 1, 1], [], []>} : vector<8x8xbf16>, vector<8x32xbf16>, vector<8x32xf32> -> vector<8x32xf32>
    %81 = arith.addf %59, %80 : vector<8x32xf32>
    %82 = vector.extract_strided_slice %25 {offsets = [0, 0, 16], sizes = [1, 8, 8], strides = [1, 1, 1]} : vector<1x8x32xbf16> to vector<1x8x8xbf16>
    %83 = vector.extract_strided_slice %30 {offsets = [0, 0, 16], sizes = [1, 8, 8], strides = [1, 1, 1]} : vector<1x8x32xbf16> to vector<1x8x8xbf16>
    %84 = vector.extract_strided_slice %35 {offsets = [0, 0, 16], sizes = [1, 8, 8], strides = [1, 1, 1]} : vector<1x8x32xbf16> to vector<1x8x8xbf16>
    "tpu.trace_start"() <{level = 10 : i32, message = "bqd,bkd->bqk"}> : () -> ()
    %cst_25 = arith.constant dense<0.000000e+00> : vector<1x8x8xf32>
    %85 = tpu.matmul %82, %83, %cst_25 {dimension_numbers = #tpu.dot_dimension_numbers<[2], [2], [1], [1], [0, 0, 0, 1, 1, 1], [0], [0]>} : vector<1x8x8xbf16>, vector<1x8x8xbf16>, vector<1x8x8xf32> -> vector<1x8x8xf32>
    "tpu.trace_stop"() : () -> ()
    %86 = arith.addf %85, %36 : vector<1x8x8xf32>
    %cst_26 = arith.constant dense<0xFF800000> : vector<1x8xf32>
    %87 = vector.multi_reduction <maximumf>, %86, %cst_26 [2] : vector<1x8x8xf32> to vector<1x8xf32>
    %88 = vector.shape_cast %87 : vector<1x8xf32> to vector<1x8x1xf32>
    %89 = vector.broadcast %88 : vector<1x8x1xf32> to vector<1x8x8xf32>
    %90 = arith.subf %86, %89 : vector<1x8x8xf32>
    %91 = math.exp %90 : vector<1x8x8xf32>
    %cst_27 = arith.constant dense<0.000000e+00> : vector<1x8xf32>
    %92 = vector.multi_reduction <add>, %91, %cst_27 [2] : vector<1x8x8xf32> to vector<1x8xf32>
    %93 = vector.shape_cast %92 : vector<1x8xf32> to vector<1x8x1xf32>
    %94 = tpu.reciprocal %93 {approx = true} : vector<1x8x1xf32> -> vector<1x8x1xf32>
    %95 = vector.broadcast %94 : vector<1x8x1xf32> to vector<1x8x8xf32>
    %96 = arith.mulf %91, %95 : vector<1x8x8xf32>
    %97 = arith.truncf %96 : vector<1x8x8xf32> to vector<1x8x8xbf16>
    "tpu.trace_start"() <{level = 10 : i32, message = "bqk,bkd->bqd"}> : () -> ()
    %cst_28 = arith.constant dense<0.000000e+00> : vector<1x8x8xf32>
    %98 = tpu.matmul %97, %84, %cst_28 {dimension_numbers = #tpu.dot_dimension_numbers<[2], [1], [1], [2], [0, 0, 0, 1, 1, 2], [0], [0]>} : vector<1x8x8xbf16>, vector<1x8x8xbf16>, vector<1x8x8xf32> -> vector<1x8x8xf32>
    "tpu.trace_stop"() : () -> ()
    %99 = vector.shape_cast %98 : vector<1x8x8xf32> to vector<8x8xf32>
    %100 = arith.truncf %99 : vector<8x8xf32> to vector<8x8xbf16>
    %101 = vector.extract_strided_slice %38 {offsets = [16, 0], sizes = [8, 32], strides = [1, 1]} : vector<32x32xbf16> to vector<8x32xbf16>
    %cst_29 = arith.constant dense<0.000000e+00> : vector<8x32xf32>
    %102 = tpu.matmul %100, %101, %cst_29 {dimension_numbers = #tpu.dot_dimension_numbers<[1], [0], [0], [1], [0, 0, 1, 1], [], []>} : vector<8x8xbf16>, vector<8x32xbf16>, vector<8x32xf32> -> vector<8x32xf32>
    %103 = arith.addf %81, %102 : vector<8x32xf32>
    %104 = vector.extract_strided_slice %25 {offsets = [0, 0, 24], sizes = [1, 8, 8], strides = [1, 1, 1]} : vector<1x8x32xbf16> to vector<1x8x8xbf16>
    %105 = vector.extract_strided_slice %30 {offsets = [0, 0, 24], sizes = [1, 8, 8], strides = [1, 1, 1]} : vector<1x8x32xbf16> to vector<1x8x8xbf16>
    %106 = vector.extract_strided_slice %35 {offsets = [0, 0, 24], sizes = [1, 8, 8], strides = [1, 1, 1]} : vector<1x8x32xbf16> to vector<1x8x8xbf16>
    "tpu.trace_start"() <{level = 10 : i32, message = "bqd,bkd->bqk"}> : () -> ()
    %cst_30 = arith.constant dense<0.000000e+00> : vector<1x8x8xf32>
    %107 = tpu.matmul %104, %105, %cst_30 {dimension_numbers = #tpu.dot_dimension_numbers<[2], [2], [1], [1], [0, 0, 0, 1, 1, 1], [0], [0]>} : vector<1x8x8xbf16>, vector<1x8x8xbf16>, vector<1x8x8xf32> -> vector<1x8x8xf32>
    "tpu.trace_stop"() : () -> ()
    %108 = arith.addf %107, %36 : vector<1x8x8xf32>
    %cst_31 = arith.constant dense<0xFF800000> : vector<1x8xf32>
    %109 = vector.multi_reduction <maximumf>, %108, %cst_31 [2] : vector<1x8x8xf32> to vector<1x8xf32>
    %110 = vector.shape_cast %109 : vector<1x8xf32> to vector<1x8x1xf32>
    %111 = vector.broadcast %110 : vector<1x8x1xf32> to vector<1x8x8xf32>
    %112 = arith.subf %108, %111 : vector<1x8x8xf32>
    %113 = math.exp %112 : vector<1x8x8xf32>
    %cst_32 = arith.constant dense<0.000000e+00> : vector<1x8xf32>
    %114 = vector.multi_reduction <add>, %113, %cst_32 [2] : vector<1x8x8xf32> to vector<1x8xf32>
    %115 = vector.shape_cast %114 : vector<1x8xf32> to vector<1x8x1xf32>
    %116 = tpu.reciprocal %115 {approx = true} : vector<1x8x1xf32> -> vector<1x8x1xf32>
    %117 = vector.broadcast %116 : vector<1x8x1xf32> to vector<1x8x8xf32>
    %118 = arith.mulf %113, %117 : vector<1x8x8xf32>
    %119 = arith.truncf %118 : vector<1x8x8xf32> to vector<1x8x8xbf16>
    "tpu.trace_start"() <{level = 10 : i32, message = "bqk,bkd->bqd"}> : () -> ()
    %cst_33 = arith.constant dense<0.000000e+00> : vector<1x8x8xf32>
    %120 = tpu.matmul %119, %106, %cst_33 {dimension_numbers = #tpu.dot_dimension_numbers<[2], [1], [1], [2], [0, 0, 0, 1, 1, 2], [0], [0]>} : vector<1x8x8xbf16>, vector<1x8x8xbf16>, vector<1x8x8xf32> -> vector<1x8x8xf32>
    "tpu.trace_stop"() : () -> ()
    %121 = vector.shape_cast %120 : vector<1x8x8xf32> to vector<8x8xf32>
    %122 = arith.truncf %121 : vector<8x8xf32> to vector<8x8xbf16>
    %123 = vector.extract_strided_slice %38 {offsets = [24, 0], sizes = [8, 32], strides = [1, 1]} : vector<32x32xbf16> to vector<8x32xbf16>
    %cst_34 = arith.constant dense<0.000000e+00> : vector<8x32xf32>
    %124 = tpu.matmul %122, %123, %cst_34 {dimension_numbers = #tpu.dot_dimension_numbers<[1], [0], [0], [1], [0, 0, 1, 1], [], []>} : vector<8x8xbf16>, vector<8x32xbf16>, vector<8x32xf32> -> vector<8x32xf32>
    %125 = arith.addf %103, %124 : vector<8x32xf32>
    %126 = vector.broadcast %11 : vector<1x32xf32> to vector<8x32xf32>
    %127 = arith.addf %125, %126 : vector<8x32xf32>
    %128 = arith.addf %4, %127 : vector<8x32xf32>
    %cst_35 = arith.constant dense<0.000000e+00> : vector<8xf32>
    %129 = vector.multi_reduction <add>, %128, %cst_35 [1] : vector<8x32xf32> to vector<8xf32>
    %130 = vector.shape_cast %129 : vector<8xf32> to vector<8x1xf32>
    %cst_36 = arith.constant 3.200000e+01 : f32
    %131 = vector.broadcast %cst_36 : f32 to vector<8x1xf32>
    %132 = arith.divf %130, %131 : vector<8x1xf32>
    %133 = vector.broadcast %132 : vector<8x1xf32> to vector<8x32xf32>
    %134 = arith.subf %128, %133 : vector<8x32xf32>
    %135 = arith.mulf %134, %134 : vector<8x32xf32>
    %cst_37 = arith.constant dense<0.000000e+00> : vector<8xf32>
    %136 = vector.multi_reduction <add>, %135, %cst_37 [1] : vector<8x32xf32> to vector<8xf32>
    %137 = vector.shape_cast %136 : vector<8xf32> to vector<8x1xf32>
    %cst_38 = arith.constant 3.200000e+01 : f32
    %138 = vector.broadcast %cst_38 : f32 to vector<8x1xf32>
    %139 = arith.divf %137, %138 : vector<8x1xf32>
    %140 = vector.broadcast %132 : vector<8x1xf32> to vector<8x32xf32>
    %141 = arith.subf %128, %140 : vector<8x32xf32>
    %cst_39 = arith.constant 9.99999974E-6 : f32
    %142 = vector.broadcast %cst_39 : f32 to vector<8x1xf32>
    %143 = arith.addf %139, %142 : vector<8x1xf32>
    %144 = math.rsqrt %143 : vector<8x1xf32>
    %145 = vector.broadcast %144 : vector<8x1xf32> to vector<8x32xf32>
    %146 = arith.mulf %141, %145 : vector<8x32xf32>
    %147 = vector.broadcast %12 : vector<1x32xf32> to vector<8x32xf32>
    %148 = arith.mulf %146, %147 : vector<8x32xf32>
    %149 = vector.broadcast %13 : vector<1x32xf32> to vector<8x32xf32>
    %150 = arith.addf %148, %149 : vector<8x32xf32>
    %151 = arith.truncf %150 : vector<8x32xf32> to vector<8x32xbf16>
    %c0_40 = arith.constant 0 : index
    %c0_41 = arith.constant 0 : index
    %c0_42 = arith.constant 0 : index
    %152 = vector.load %arg7[%c0_40, %c0_41, %c0_42] : memref<1x32x64xbf16, #tpu.memory_space<vmem>>, vector<1x32x64xbf16>
    %153 = vector.shape_cast %152 : vector<1x32x64xbf16> to vector<32x64xbf16>
    %cst_43 = arith.constant dense<0.000000e+00> : vector<8x64xf32>
    %154 = tpu.matmul %151, %153, %cst_43 {dimension_numbers = #tpu.dot_dimension_numbers<[1], [0], [0], [1], [0, 0, 1, 1], [], []>} : vector<8x32xbf16>, vector<32x64xbf16>, vector<8x64xf32> -> vector<8x64xf32>
    %155 = vector.broadcast %14 : vector<1x64xf32> to vector<8x64xf32>
    %156 = arith.addf %154, %155 : vector<8x64xf32>
    %cst_44 = arith.constant 5.000000e-01 : f32
    %157 = vector.broadcast %cst_44 : f32 to vector<8x64xf32>
    %158 = arith.mulf %157, %156 : vector<8x64xf32>
    %cst_45 = arith.constant 0.707106769 : f32
    %159 = vector.broadcast %cst_45 : f32 to vector<8x64xf32>
    %160 = arith.mulf %156, %159 : vector<8x64xf32>
    %cst_46 = arith.constant 0.000000e+00 : f32
    %161 = vector.broadcast %cst_46 : f32 to vector<8x64xf32>
    %162 = arith.cmpf olt, %160, %161 : vector<8x64xf32>
    %cst_47 = arith.constant -1.000000e+00 : f32
    %cst_48 = arith.constant 1.000000e+00 : f32
    %163 = vector.broadcast %cst_47 : f32 to vector<8x64xf32>
    %164 = vector.broadcast %cst_48 : f32 to vector<8x64xf32>
    %165 = arith.select %162, %163, %164 : vector<8x64xi1>, vector<8x64xf32>
    %166 = math.absf %160 : vector<8x64xf32>
    %cst_49 = arith.constant 0.327591091 : f32
    %167 = vector.broadcast %cst_49 : f32 to vector<8x64xf32>
    %168 = arith.mulf %167, %166 : vector<8x64xf32>
    %cst_50 = arith.constant 1.000000e+00 : f32
    %169 = vector.broadcast %cst_50 : f32 to vector<8x64xf32>
    %170 = arith.addf %169, %168 : vector<8x64xf32>
    %cst_51 = arith.constant 1.000000e+00 : f32
    %171 = vector.broadcast %cst_51 : f32 to vector<8x64xf32>
    %172 = arith.divf %171, %170 : vector<8x64xf32>
    %cst_52 = arith.constant 1.06140542 : f32
    %173 = vector.broadcast %cst_52 : f32 to vector<8x64xf32>
    %174 = arith.mulf %173, %172 : vector<8x64xf32>
    %cst_53 = arith.constant -1.45315206 : f32
    %175 = vector.broadcast %cst_53 : f32 to vector<8x64xf32>
    %176 = arith.addf %174, %175 : vector<8x64xf32>
    %177 = arith.mulf %176, %172 : vector<8x64xf32>
    %cst_54 = arith.constant 1.42141378 : f32
    %178 = vector.broadcast %cst_54 : f32 to vector<8x64xf32>
    %179 = arith.addf %177, %178 : vector<8x64xf32>
    %180 = arith.mulf %179, %172 : vector<8x64xf32>
    %cst_55 = arith.constant -0.284496725 : f32
    %181 = vector.broadcast %cst_55 : f32 to vector<8x64xf32>
    %182 = arith.addf %180, %181 : vector<8x64xf32>
    %183 = arith.mulf %182, %172 : vector<8x64xf32>
    %cst_56 = arith.constant 0.254829586 : f32
    %184 = vector.broadcast %cst_56 : f32 to vector<8x64xf32>
    %185 = arith.addf %183, %184 : vector<8x64xf32>
    %186 = arith.mulf %185, %172 : vector<8x64xf32>
    %cst_57 = arith.constant 0.000000e+00 : f32
    %187 = vector.broadcast %cst_57 : f32 to vector<8x64xf32>
    %188 = arith.subf %187, %166 : vector<8x64xf32>
    %189 = arith.mulf %188, %166 : vector<8x64xf32>
    %190 = math.exp %189 : vector<8x64xf32>
    %191 = arith.mulf %186, %190 : vector<8x64xf32>
    %cst_58 = arith.constant 1.000000e+00 : f32
    %192 = vector.broadcast %cst_58 : f32 to vector<8x64xf32>
    %193 = arith.subf %192, %191 : vector<8x64xf32>
    %194 = arith.mulf %165, %193 : vector<8x64xf32>
    %cst_59 = arith.constant 1.000000e+00 : f32
    %195 = vector.broadcast %cst_59 : f32 to vector<8x64xf32>
    %196 = arith.addf %195, %194 : vector<8x64xf32>
    %197 = arith.mulf %158, %196 : vector<8x64xf32>
    %198 = arith.truncf %197 : vector<8x64xf32> to vector<8x64xbf16>
    %c0_60 = arith.constant 0 : index
    %c0_61 = arith.constant 0 : index
    %c0_62 = arith.constant 0 : index
    %199 = vector.load %arg8[%c0_60, %c0_61, %c0_62] : memref<1x64x32xbf16, #tpu.memory_space<vmem>>, vector<1x64x32xbf16>
    %200 = vector.shape_cast %199 : vector<1x64x32xbf16> to vector<64x32xbf16>
    %cst_63 = arith.constant dense<0.000000e+00> : vector<8x32xf32>
    %201 = tpu.matmul %198, %200, %cst_63 {dimension_numbers = #tpu.dot_dimension_numbers<[1], [0], [0], [1], [0, 0, 1, 1], [], []>} : vector<8x64xbf16>, vector<64x32xbf16>, vector<8x32xf32> -> vector<8x32xf32>
    %202 = vector.broadcast %15 : vector<1x32xf32> to vector<8x32xf32>
    %203 = arith.addf %201, %202 : vector<8x32xf32>
    %204 = arith.addf %150, %203 : vector<8x32xf32>
    %cst_64 = arith.constant dense<0.000000e+00> : vector<8xf32>
    %205 = vector.multi_reduction <add>, %204, %cst_64 [1] : vector<8x32xf32> to vector<8xf32>
    %206 = vector.shape_cast %205 : vector<8xf32> to vector<8x1xf32>
    %cst_65 = arith.constant 3.200000e+01 : f32
    %207 = vector.broadcast %cst_65 : f32 to vector<8x1xf32>
    %208 = arith.divf %206, %207 : vector<8x1xf32>
    %209 = vector.broadcast %208 : vector<8x1xf32> to vector<8x32xf32>
    %210 = arith.subf %204, %209 : vector<8x32xf32>
    %211 = arith.mulf %210, %210 : vector<8x32xf32>
    %cst_66 = arith.constant dense<0.000000e+00> : vector<8xf32>
    %212 = vector.multi_reduction <add>, %211, %cst_66 [1] : vector<8x32xf32> to vector<8xf32>
    %213 = vector.shape_cast %212 : vector<8xf32> to vector<8x1xf32>
    %cst_67 = arith.constant 3.200000e+01 : f32
    %214 = vector.broadcast %cst_67 : f32 to vector<8x1xf32>
    %215 = arith.divf %213, %214 : vector<8x1xf32>
    %216 = vector.broadcast %208 : vector<8x1xf32> to vector<8x32xf32>
    %217 = arith.subf %204, %216 : vector<8x32xf32>
    %cst_68 = arith.constant 9.99999974E-6 : f32
    %218 = vector.broadcast %cst_68 : f32 to vector<8x1xf32>
    %219 = arith.addf %215, %218 : vector<8x1xf32>
    %220 = math.rsqrt %219 : vector<8x1xf32>
    %221 = vector.broadcast %220 : vector<8x1xf32> to vector<8x32xf32>
    %222 = arith.mulf %217, %221 : vector<8x32xf32>
    %223 = vector.broadcast %16 : vector<1x32xf32> to vector<8x32xf32>
    %224 = arith.mulf %222, %223 : vector<8x32xf32>
    %225 = vector.broadcast %17 : vector<1x32xf32> to vector<8x32xf32>
    %226 = arith.addf %224, %225 : vector<8x32xf32>
    %c1_i32 = arith.constant 1 : i32
    %227 = arith.cmpi slt, %arg1, %c1_i32 : i32
    %228 = arith.extui %227 : i1 to i32
    %c0_i32_69 = arith.constant 0 : i32
    %229 = arith.cmpi ne, %228, %c0_i32_69 : i32
    scf.if %229 {
      %233 = vector.shape_cast %226 : vector<8x32xf32> to vector<1x8x32xf32>
      %c0_72 = arith.constant 0 : index
      %c0_73 = arith.constant 0 : index
      %c0_74 = arith.constant 0 : index
      %234 = vector.load %arg11[%c0_72, %c0_73, %c0_74] : memref<1x8x32xf32, #tpu.memory_space<vmem>>, vector<1x8x32xf32>
      tpu.vector_store %arg11[%c0_72, %c0_73, %c0_74], %233 {strides = array<i32>} : memref<1x8x32xf32, #tpu.memory_space<vmem>>, vector<1x8x32xf32>,
    } else {
    }
    %c1_i32_70 = arith.constant 1 : i32
    %230 = arith.cmpi eq, %arg1, %c1_i32_70 : i32
    %231 = arith.extui %230 : i1 to i32
    %c0_i32_71 = arith.constant 0 : i32
    %232 = arith.cmpi ne, %231, %c0_i32_71 : i32
    scf.if %232 {
      %c0_72 = arith.constant 0 : index
      %c0_73 = arith.constant 0 : index
      %233 = vector.load %arg10[%c0_72, %c0_73] : memref<2x32xf32, #tpu.memory_space<vmem>>, vector<1x32xf32>
      %c1 = arith.constant 1 : index
      %c0_74 = arith.constant 0 : index
      %234 = vector.load %arg10[%c1, %c0_74] : memref<2x32xf32, #tpu.memory_space<vmem>>, vector<1x32xf32>
      %cst_75 = arith.constant dense<0.000000e+00> : vector<8xf32>
      %235 = vector.multi_reduction <add>, %226, %cst_75 [1] : vector<8x32xf32> to vector<8xf32>
      %236 = vector.shape_cast %235 : vector<8xf32> to vector<8x1xf32>
      %cst_76 = arith.constant 3.200000e+01 : f32
      %237 = vector.broadcast %cst_76 : f32 to vector<8x1xf32>
      %238 = arith.divf %236, %237 : vector<8x1xf32>
      %239 = vector.broadcast %238 : vector<8x1xf32> to vector<8x32xf32>
      %240 = arith.subf %226, %239 : vector<8x32xf32>
      %241 = arith.mulf %240, %240 : vector<8x32xf32>
      %cst_77 = arith.constant dense<0.000000e+00> : vector<8xf32>
      %242 = vector.multi_reduction <add>, %241, %cst_77 [1] : vector<8x32xf32> to vector<8xf32>
      %243 = vector.shape_cast %242 : vector<8xf32> to vector<8x1xf32>
      %cst_78 = arith.constant 3.200000e+01 : f32
      %244 = vector.broadcast %cst_78 : f32 to vector<8x1xf32>
      %245 = arith.divf %243, %244 : vector<8x1xf32>
      %246 = vector.broadcast %238 : vector<8x1xf32> to vector<8x32xf32>
      %247 = arith.subf %226, %246 : vector<8x32xf32>
      %cst_79 = arith.constant 9.99999974E-6 : f32
      %248 = vector.broadcast %cst_79 : f32 to vector<8x1xf32>
      %249 = arith.addf %245, %248 : vector<8x1xf32>
      %250 = math.rsqrt %249 : vector<8x1xf32>
      %251 = vector.broadcast %250 : vector<8x1xf32> to vector<8x32xf32>
      %252 = arith.mulf %247, %251 : vector<8x32xf32>
      %253 = vector.broadcast %233 : vector<1x32xf32> to vector<8x32xf32>
      %254 = arith.mulf %252, %253 : vector<8x32xf32>
      %255 = vector.broadcast %234 : vector<1x32xf32> to vector<8x32xf32>
      %256 = arith.addf %254, %255 : vector<8x32xf32>
      %257 = vector.shape_cast %256 : vector<8x32xf32> to vector<1x8x32xf32>
      %c0_80 = arith.constant 0 : index
      %c0_81 = arith.constant 0 : index
      %c0_82 = arith.constant 0 : index
      %258 = vector.load %arg11[%c0_80, %c0_81, %c0_82] : memref<1x8x32xf32, #tpu.memory_space<vmem>>, vector<1x8x32xf32>
      tpu.vector_store %arg11[%c0_80, %c0_81, %c0_82], %257 {strides = array<i32>} : memref<1x8x32xf32, #tpu.memory_space<vmem>>, vector<1x8x32xf32>,
    } else {
    }
    return
  }
  func.func @transform_0(%arg0: i32, %arg1: i32) -> (i32, i32, i32) {
    %c0_i32 = arith.constant 0 : i32
    %c0_i32_0 = arith.constant 0 : i32
    %c0_i32_1 = arith.constant 0 : i32
    return %arg0, %c0_i32, %c0_i32_0 : i32, i32, i32
  }
  func.func @transform_1(%arg0: i32, %arg1: i32) -> (i32, i32) {
    %c0_i32 = arith.constant 0 : i32
    %c0_i32_0 = arith.constant 0 : i32
    %c0_i32_1 = arith.constant 0 : i32
    return %c0_i32, %c0_i32_0 : i32, i32
  }
  func.func @transform_2(%arg0: i32, %arg1: i32) -> (i32, i32, i32) {
    %c0_i32 = arith.constant 0 : i32
    %c0_i32_0 = arith.constant 0 : i32
    %c0_i32_1 = arith.constant 0 : i32
    return %arg0, %c0_i32, %c0_i32_0 : i32, i32, i32
  }
  func.func @transform_3(%arg0: i32, %arg1: i32) -> (i32, i32, i32) {
    %c0_i32 = arith.constant 0 : i32
    %c0_i32_0 = arith.constant 0 : i32
    %c0_i32_1 = arith.constant 0 : i32
    return %arg1, %c0_i32, %c0_i32_0 : i32, i32, i32
  }
  func.func @transform_4(%arg0: i32, %arg1: i32) -> (i32, i32, i32) {
    %c0_i32 = arith.constant 0 : i32
    %c0_i32_0 = arith.constant 0 : i32
    %c0_i32_1 = arith.constant 0 : i32
    return %arg1, %c0_i32, %c0_i32_0 : i32, i32, i32
  }
  func.func @transform_5(%arg0: i32, %arg1: i32) -> (i32, i32, i32) {
    %c0_i32 = arith.constant 0 : i32
    %c0_i32_0 = arith.constant 0 : i32
    %c0_i32_1 = arith.constant 0 : i32
    return %arg1, %c0_i32, %c0_i32_0 : i32, i32, i32
  }
  func.func @transform_6(%arg0: i32, %arg1: i32) -> (i32, i32, i32) {
    %c0_i32 = arith.constant 0 : i32
    %c0_i32_0 = arith.constant 0 : i32
    %c0_i32_1 = arith.constant 0 : i32
    return %arg1, %c0_i32, %c0_i32_0 : i32, i32, i32
  }
  func.func @transform_7(%arg0: i32, %arg1: i32) -> (i32, i32, i32) {
    %c0_i32 = arith.constant 0 : i32
    %c0_i32_0 = arith.constant 0 : i32
    %c0_i32_1 = arith.constant 0 : i32
    return %arg1, %c0_i32, %c0_i32_0 : i32, i32, i32
  }
  func.func @transform_8(%arg0: i32, %arg1: i32) -> (i32, i32) {
    %c0_i32 = arith.constant 0 : i32
    %c0_i32_0 = arith.constant 0 : i32
    %c0_i32_1 = arith.constant 0 : i32
    return %c0_i32, %c0_i32_0 : i32, i32
  }
  func.func @transform_9(%arg0: i32, %arg1: i32) -> (i32, i32, i32) {
    %c0_i32 = arith.constant 0 : i32
    %c0_i32_0 = arith.constant 0 : i32
    %c0_i32_1 = arith.constant 0 : i32
    return %arg0, %c0_i32, %c0_i32_0 : i32, i32, i32
  }
}

</mosaic_0001>

<bundles_post_ra>
// kernel: tpu_custom_call.1
= control target key start
LH: loop header
LB: loop body
LE: loop exit
PB: predicated region body
PF: predicated region fallthrough
CT: control target
= control target key end

     0   :  { %s2428_s0 = inlined_call_operand.vmem [shape: f32[2,8,32], index: 0, kind: input, shape index: {}]   ;;  %s2429_s1 = inlined_call_operand.vmem [shape: f32[8,8], index: 1, kind: input, shape index: {}]   ;;  %s2430_s2 = inlined_call_operand.vmem [shape: f32[2,1,8], index: 2, kind: input, shape index: {}]   ;;  %s2431_s3 = inlined_call_operand.vmem [shape: bf16[2,32,96], index: 3, kind: input, shape index: {}]   ;;  %s2432_s4 = inlined_call_operand.vmem [shape: bf16[2,32,32], index: 4, kind: input, shape index: {}]   ;;  %s2433_s5 = inlined_call_operand.vmem [shape: bf16[2,32,64], index: 5, kind: input, shape index: {}]   ;;  %s2434_s6 = inlined_call_operand.vmem [shape: bf16[2,64,32], index: 6, kind: input, shape index: {}]   ;;  %s2435_s7 = inlined_call_operand.vmem [shape: f32[2,10,64], index: 7, kind: input, shape index: {}]   ;;  %s2436_s8 = inlined_call_operand.vmem [shape: f32[2,32], index: 8, kind: input, shape index: {}]   ;;  %s2437_s9 = inlined_call_operand.hbm [shape: f32[2,8,32], index: 9, kind: output, shape index: {}]  }
   0x1   :  { %2451 = sst [smem:[#allocation17_spill]] %s2437_s9 }
   0x2   :  { %14 = vsyncpa [#allocation4], 0 }
   0x3   :  { %16 = vsyncpa [#allocation4 + $0x1], 0  ;;  %s2087_s30 = smov 0   ;;  %s2089_s10 = smov 0  }
   0x4   :  { %s2091_s11 = smov 0   ;;  %s2093_s12 = smov 0  }
   0x5   :  { %s2095_s13 = smov 0   ;;  %s2097_s14 = smov 0  }
   0x6   :  { %s2099_s15 = smov 0   ;;  %s2101_s16 = smov 0  }
   0x7 LB: > { %2452 = sst [smem:[#allocation6_spill]] %s1991_s30  ;;  %s1615_s17 = sadd.s32 4294967295, %s2019_s16   ;;  %s2019_s16 = sphi %s2101_s16, %s22_s16   ;;  %s2015_s15 = sphi %s2099_s15, %s2479_s15   ;;  %s2011_s14 = sphi %s2097_s14, %s2478_s14   ;;  %s2007_s13 = sphi %s2095_s13, %s2477_s13   ;;  %s2003_s12 = sphi %s2093_s12, %s2476_s12   ;;  %s1999_s11 = sphi %s2091_s11, %s2475_s11   ;;  %s1995_s10 = sphi %s2089_s10, %s2474_s10   ;;  %s1991_s30 = sphi %s2087_s30, %s2473_s30  }
   0x8   : > { %2453 = sst [smem:[#allocation7_spill]] %s1995_s10  ;;  %s1616_s18 = sadd.s32 4294967294, %s2019_s16  }
   0x9   : > { %2454 = sst [smem:[#allocation8_spill]] %s1999_s11  ;;  %s31_s19 = sadd.s32 1, %s2011_s14 }
   0xa   : > { %2455 = sst [smem:[#allocation9_spill]] %s2011_s14  ;;  %p32_p0 = scmp.ge.s32.totalorder %s31_s19, 2 }
   0xb   : > { %2456 = sst [smem:[#allocation10_spill]] %s2015_s15  ;;  %s34_s20 = sadd.s32 1, %s2015_s15 }
   0xc   : > { %2457 = sst [smem:[#allocation11_spill]] %s2019_s16  ;;  %p275_p1 = scmp.ne.s32.totalorder %s1999_s11, %s1995_s10 }
   0xd   : > { %p276_p2 = scmp.eq.s32.totalorder %s1615_s17, 3  ;;  %s2481_s19 = smov (%p32_p0, %s31_s19), 0 }
   0xe   : > { %2458 = sst [smem:[#allocation12_spill]] %s2481_s19  ;;  %s2483_s20 = smov (!%p32_p0, %s34_s20), %s2015_s15 }
   0xf   : > { %p2136_p3 = por %p276_p2, %p275_p1  ;;  %p281_p4 = scmp.ne.s32.totalorder %s1995_s10, %s1991_s30 }
  0x10   : > { %p36_p5 = scmp.ge.s32.totalorder %s2483_s20, 2  ;;  %p282_p6 = scmp.eq.s32.totalorder %s1616_s18, 3 }
  0x11   : > { %s2459_s21 = scalar_select %p2136_p3, 1, 0 }
  0x12   : > { %p1619_p7 = scmp.ge.s32.totalorder %s2019_s16, 1  ;;  %p359_p8 = scmp.lt.s32.totalorder %s2019_s16, 5 }
  0x13   : > { %2460 = sst [smem:[#allocation13_spill]] %s2459_s21  ;;  %s2485_s20 = smov (%p36_p5, %s2483_s20), 0 }
  0x14   : > { %2461 = sst [smem:[#allocation14_spill]] %s2485_s20  ;;  %p2146_p9 = por %p282_p6, %p281_p4 }
  0x15   : > { %p360_p10 = pnand %p1619_p7, %p359_p8  ;;  %s262_s23 = ssub.s32 %s2015_s15, %s2485_s20 }
  0x16   : > { %s2462_s22 = scalar_select %p2146_p9, 1, 0 }
  0x17   : > { %s265_s24 = sadd.s32 1, %s1999_s11  ;;  %p263_p11 = scmp.eq.s32.totalorder %s262_s23, 0 }
  0x18   : > { %2463 = sst [smem:[#allocation15_spill]] %s2462_s22  ;;  %363 = sbr.rel (%p360_p10) target bundleno = 4103 (0x1007), region = 56 }
  0x19   : > { %s2154_s25 = scalar_select %p263_p11, %s1999_s11, %s265_s24  }
  0x1a   : > { %s2446_s26 = sand.u32 (!%p360_p10), 1, %s1995_s10   ;;  %p422_p12 = scmp.lt.s32.totalorder (!%p360_p10), %s2007_s13, 1 }
  0x1b   : > { %2464 = sst [smem:[#allocation16_spill]] %s2154_s25  ;;  %s1620_s27 = sshll.u32 (!%p360_p10), %s2446_s26, 3 }
  0x1c   : > { %p429_p13 = scmp.lt.s32.totalorder (!%p360_p10), %s2003_s12, 1  ;;  %s2192_s25 = scalar_lea.vmem (!%p360_p10), [#allocation3], %s1620_s27 }
  0x1d   : > { %p1632_p0 = scmp.ne.s32.totalorder (!%p360_p10), %s2003_s12, 0 }
  0x1f   : > { %s423_s28 = scalar_select %p422_p12, %s2007_s13, 1 }
  0x20   : > { %s430_s29 = scalar_select %p429_p13, %s2003_s12, 1 }
  0x21   : > { %s1621_s17 = sshll.u32 %s423_s28, 3  ;;  %s428_s23 = scalar_lea.vmem %s2430_s2, %s423_s28  ;;  %vm460_vm0 = vcmask (!%p1632_p0), 261120   ;;  %v462_v1 = vld [vmem:[%s2429_s1] sm:$0xff] (!%p1632_p0)  ;;  %vm471_vm1 = vcmask (!%p1632_p0), 64512  }
  0x22   : > { %s425_s15 = scalar_lea.vmem %s2428_s0, %s1621_s17  ;;  %s1665_s14 = sshll.u32 %s430_s29, 4  ;;  %v1633_v2 = vld [vmem:[%s428_s23] ss:$0 sm:$0xff] (!%p1632_p0) }
  0x23   : > { %s433_s22 = scalar_lea.vmem %s2431_s3, %s1665_s14  ;;  %s2175_s26 = scalar_lea.vmem %s2432_s4, %s1665_s14  ;;  %v459_v0 = vld [vmem:[%s425_s15] sm:$0xff] (!%p1632_p0)  ;;  %v470_v3 = vadd.f32 (!%p1632_p0), %v1633_v2, %v462_v1 }
  0x24   : > { %s2180_s10 = scalar_lea.vmem %s2433_s5, %s1665_s14  ;;  %s1668_s20 = sshll.u32 %s430_s29, 5  ;;  %461 = vst.msk [vmem:[%s2192_s25] sm:$0xff] (!%p1632_p0), %vm460_vm0, %v459_v0 }
  0x25   : > { %s2185_s19 = scalar_lea.vmem %s2434_s6, %s1668_s20  ;;  %s2190_s11 = scalar_lea.vmem %s2435_s7, %s1665_s14  ;;  %472 = vst.msk [vmem:[#allocation2] sm:$0xff] (!%p1632_p0), %vm471_vm1, %v470_v3 }
  0x26   : > { %458 = sbr.rel (%p1632_p0) target bundleno = 45 (0x2d), region = 60 }
  0x2d PF: > { %v1891_v4 = vld [vmem:[%s433_s22] sm:$0xff]   ;;  %v537_v5 = vlaneseq  ;;  %v2021_v6 = vmov 0.0   ;;  %v1892_v7 = vld [vmem:[%s433_s22 + $0x8] sm:$0xff]   ;;  %vm2022_vm2 = vmmov 0   ;;  %vm493_vm3 = vcmask 261120   ;;  %s2023_s14 = smov 32  }
  0x2e   : > { %1705 = vmatprep.subr.bf16.mxu1 %v2021_v6  ;;  %1719 = vmatprep.subr.bf16.mxu0 %v2021_v6  ;;  %v2204_v8 = vld [vmem:[%s2192_s25] sm:$0xff]  ;;  %v2210_v10 = vld [vmem:[%s2190_s11] sm:$0xff]  ;;  %s2024_s15 = smov 88   ;;  %s2025_s16 = smov 96   ;;  %vm571_vm4 = vcmask 64512   ;;  %vm636_vm5 = vcmask 1043456  }
  0x2f   : > { %1706 = vmatpush3.bf16.msra.mxu1 %v1891_v4  ;;  %1709 = vmatprep.mubr.msk.bf16.mxu1 %vm2022_vm2, %v2021_v6  ;;  %v2206_v9 = vshrl.u32 %v537_v5, 7  ;;  %v474_v12 = vpack.c.bf16 %v2204_v8, %v2204_v8  ;;  %s2026_s21 = smov 120   ;;  %v2246_v30 = vld [vmem:[#allocation2] sm:$0xff]  ;;  %s2027_s22 = smov 64   ;;  %vm1359_vm7 = vcmask 523264  }
  0x30   : > { %1707 = vmatprep.subr.bf16.mxu1 %v2021_v6  ;;  %1721 = vmatprep.mubr.msk.bf16.mxu0 %vm2022_vm2, %v2021_v6  ;;  %s2028_s27 = smov 56   ;;  %s2029_s29 = smov 80  }
  0x31   : > { %v545_v11 = vsub.s32 1, %v2206_v9  ;;  %v539_v14 = vsub.s32 0, %v2206_v9  ;;  %v555_v43 = vsub.s32 2, %v2206_v9  ;;  %s2030_s23 = smov 112   ;;  %s2031_s20 = smov 72  }
  0x32   : > { %s2032_s28 = smov 104   ;;  %s2033_s18 = smov 48  }
  0x33   : > { %1708 = vmatpush3.bf16.msra.mxu1 %v1892_v7  ;;  %v546_v13 = vrot.slane %v2210_v10, %v545_v11  ;;  %v540_v16 = vrot.slane %v2210_v10, %v539_v14  ;;  %v556_v44 = vrot.slane %v2210_v10, %v555_v43  ;;  %v564_v7 = vld [vmem:[%s2175_s26] sm:$0xf]  ;;  %s2034_s17 = smov 40   ;;  %p1657_p1 = scmp.ge.s32.totalorder %s2003_s12, 1 }
  0x34   : > { %1713 = vmatprep.subr.bf16.mxu1 %v2021_v6 }
  0x35   : > { %548 = vrot.lane.b32.xlu0 %v546_v13, %s2023_s14  ;;  %v565_v13 = vld [vmem:[%s2175_s26 + $0x4] sm:$0xf] }
  0x36   : > { %1710 = vmatmul.mubr.msk.bf16.vlgmr.msra.gmra.mrb[0].mxu1 %vm493_vm3, %v474_v12  ;;  %v843_v12 = vsel %vm636_vm5, %v564_v7, 0 }
  0x37   : > { %1715 = vmatprep.mubr.msk.bf16.mxu1 %vm2022_vm2, %v2021_v6 }
  0xa7   : > { %v549_v15 = vpop.permute.xlu0 %548 }
 0x109   : > { %v531_v17 = vpop.f32.mrb[0].mxu1 }
 0x10a   : > { %v551_v18 = vadd.f32 %v549_v15, %v531_v17  ;;  %v1711_v19 = vpop.f32.mrb[1].mxu1  ;;  %v541_v21 = vadd.f32 %v540_v16, %v531_v17  ;;  %v797_v15 = vsel %vm636_vm5, %v565_v13, 0 }
 0x10b   : > { %v534_v20 = vpop.f32.mrb[2].mxu1 }
 0x10c   : > { %v2228_v22 = vpack.c.bf16 %v551_v18, %v551_v18  ;;  %v1712_v23 = vpop.f32.mrb[3].mxu1  ;;  %v2232_v24 = vpack.c.bf16 %v541_v21, %v541_v21 }
 0x10e   : > { %684 = vrot.lane.b32.xlu1 %v2228_v22, %s2024_s15  ;;  %569 = vrot.lane.b32.xlu0 %v2228_v22, %s2025_s16 }
 0x112   : > { %682 = vrot.lane.b32.xlu1 %v2232_v24, %s2026_s21 }
 0x180   : > { %v570_v25 = vpop.permute.xlu0 %569  ;;  %v685_v27 = vpop.permute.xlu1 %684 }
 0x181   : > { %v576_v26 = vsel %vm571_vm4, %v570_v25, 0  ;;  %v690_v28 = vsel %vm571_vm4, %v685_v27, 0 }
 0x182   : > { %1714 = vmatpush3.bf16.xpose.msra.mxu1 %v576_v26 }
 0x183   : > { %1725 = vmatprep.subr.bf16.mxu1 %v2021_v6 }
 0x184   : > { %v683_v29 = vpop.permute.xlu1 %682 }
 0x189   : > { %1716 = vmatmul.mubr.msk.bf16.vlgmr.msra.gmra.mrb[4].mxu1 %vm571_vm4, %v2232_v24 }
 0x18a   : > { %1726 = vmatpush3.bf16.xpose.msra.mxu1 %v690_v28  ;;  %1727 = vmatprep.mubr.msk.bf16.mxu1 %vm2022_vm2, %v2021_v6 }
 0x18b   : > { %1737 = vmatprep.subr.bf16.mxu1 %v2021_v6 }
 0x191   : > { %1728 = vmatmul.mubr.msk.bf16.vlgmr.msra.gmra.mrb[8].mxu1 %vm571_vm4, %v683_v29 }
 0x192   : > { %1739 = vmatprep.mubr.msk.bf16.mxu1 %vm2022_vm2, %v2021_v6  ;;  %1738 = vmatpush3.bf16.msra.mxu1 %v797_v15 }
 0x193   : > { %1749 = vmatprep.subr.bf16.mxu1 %v2021_v6 }
 0x25c   : > { %v612_v31 = vpop.f32.mrb[4].mxu1 }
 0x25d   : > { %v613_v32 = vadd.f32 %v612_v31, %v2246_v30  ;;  %v1717_v33 = vpop.f32.mrb[5].mxu1 }
 0x25e   : > { %v615_v34 = vpop.f32.mrb[6].mxu1 }
 0x25f   : > { %v1718_v35 = vpop.f32.mrb[7].mxu1  ;;  %v618_v36 = vsel %vm571_vm4, %v613_v32, -inf }
 0x260   : > { %619 = vmax.xlane.f32.xlu0 %v618_v36 }
 0x264   : > { %v726_v37 = vpop.f32.mrb[8].mxu1 }
 0x265   : > { %v727_v38 = vadd.f32 %v726_v37, %v2246_v30  ;;  %v1729_v39 = vpop.f32.mrb[9].mxu1 }
 0x266   : > { %v729_v40 = vpop.f32.mrb[10].mxu1 }
 0x267   : > { %v1730_v41 = vpop.f32.mrb[11].mxu1  ;;  %v732_v42 = vsel %vm571_vm4, %v727_v38, -inf }
 0x268   : > { %733 = vmax.xlane.f32.xlu1 %v732_v42 }
 0x276   : > { %558 = vrot.lane.b32.xlu0 %v556_v44, %s2027_s22 }
 0x2ed   : > { %v620_v45 = vpop.xlane.xlu0 %619 }
 0x2ee   : > { %v621_v46 = vsub.f32 %v613_v32, %v620_v45 }
 0x2f0   : > { %v622_v47 = vmul.f32 1.442695, %v621_v46 }
 0x2f1   : > { %v559_v48 = vpop.permute.xlu0 %558 }
 0x2f2   : > { %1899 = vpow2.f32 %v622_v47  ;;  %v561_v49 = vadd.f32 %v559_v48, %v531_v17 }
 0x2f4   : > { %v2254_v50 = vpack.c.bf16 %v561_v49, %v561_v49 }
 0x2f5   : > { %v734_v51 = vpop.xlane.xlu1 %733 }
 0x2f6   : > { %v735_v52 = vsub.f32 %v727_v38, %v734_v51  ;;  %744 = vrot.lane.b32.xlu0 %v2254_v50, %s2028_s27 }
 0x2f8   : > { %v736_v53 = vmul.f32 1.442695, %v735_v52 }
 0x2fa   : > { %1901 = vpow2.f32 %v736_v53  ;;  %887 = vrot.lane.b32.xlu0 %v2228_v22, %s2029_s29 }
 0x2fc   : > { %v1900_v54 = vpop.eup %1899 }
 0x2fd   : > { %v624_v55 = vsel %vm571_vm4, %v1900_v54, 0.0 }
 0x2fe   : > { %885 = vrot.lane.b32.xlu0 %v2232_v24, %s2030_s23  ;;  %625 = vadd.xlane.f32.xlu1 %v624_v55 }
 0x304   : > { %v1902_v56 = vpop.eup %1901 }
 0x305   : > { %v738_v57 = vsel %vm571_vm4, %v1902_v56, 0.0 }
 0x306   : > { %739 = vadd.xlane.f32.xlu1 %v738_v57 }
 0x317   : > { %631 = vrot.lane.b32.xlu1 %v2254_v50, %s2027_s22 }
 0x368   : > { %v745_v0 = vpop.permute.xlu0 %744 }
 0x369   : > { %v750_v2 = vsel %vm636_vm5, %v745_v0, 0 }
 0x36c   : > { %v888_v21 = vpop.permute.xlu0 %887 }
 0x36d   : > { %v893_v28 = vsel %vm571_vm4, %v888_v21, 0  ;;  %v567_v21 = vld [vmem:[%s2175_s26 + $0xc] sm:$0xf] }
 0x370   : > { %v886_v31 = vpop.permute.xlu0 %885 }
 0x38b   : > { %v626_v58 = vpop.xlane.xlu1 %625 }
 0x38c   : > { %1903 = vrcp.f32 %v626_v58 }
 0x393   : > { %v740_v59 = vpop.xlane.xlu1 %739 }
 0x394   : > { %1905 = vrcp.f32 %v740_v59 }
 0x396   : > { %v1904_v60 = vpop.eup %1903 }
 0x397   : > { %v632_v61 = vpop.permute.xlu1 %631  ;;  %v628_v62 = vmul.f32 %v1904_v60, %v1900_v54  ;;  %v566_v60 = vld [vmem:[%s2175_s26 + $0x8] sm:$0xf] }
 0x398   : > { %v638_v63 = vsel %vm636_vm5, %v632_v61, 0  ;;  %v1000_v61 = vsel %vm636_vm5, %v566_v60, 0 }
 0x399   : > { %1720 = vmatpush3.bf16.msra.mxu0 %v638_v63  ;;  %v629_v1 = vpack.c.bf16 %v628_v62, %v628_v62 }
 0x39a   : > { %1731 = vmatprep.subr.bf16.mxu0 %v2021_v6 }
 0x39c   : > { %1722 = vmatmul.mubr.msk.bf16.vlgmr.msra.gmra.mrb[0].mxu0 %vm571_vm4, %v629_v1 }
 0x39d   : > { %1732 = vmatpush3.bf16.msra.mxu0 %v750_v2  ;;  %1733 = vmatprep.mubr.msk.bf16.mxu0 %vm2022_vm2, %v2021_v6 }
 0x39e   : > { %v1906_v3 = vpop.eup %1905  ;;  %1743 = vmatprep.subr.bf16.mxu0 %v2021_v6 }
 0x39f   : > { %v742_v4 = vmul.f32 %v1906_v3, %v1902_v56 }
 0x3a1   : > { %v743_v5 = vpack.c.bf16 %v742_v4, %v742_v4 }
 0x3a4   : > { %1734 = vmatmul.mubr.msk.bf16.vlgmr.msra.gmra.mrb[4].mxu0 %vm571_vm4, %v743_v5 }
 0x3a5   : > { %1745 = vmatprep.mubr.msk.bf16.mxu0 %vm2022_vm2, %v2021_v6  ;;  %1744 = vmatpush3.bf16.msra.mxu0 %v843_v12 }
 0x3a6   : > { %1755 = vmatprep.subr.bf16.mxu0 %v2021_v6 }
 0x46f   : > { %v674_v16 = vpop.f32.mrb[0].mxu0 }
 0x470   : > { %v680_v17 = vpack.c.bf16 %v674_v16, %v674_v16  ;;  %v1723_v18 = vpop.f32.mrb[1].mxu0 }
 0x471   : > { %v677_v19 = vpop.f32.mrb[2].mxu0 }
 0x472   : > { %v1724_v20 = vpop.f32.mrb[3].mxu0  ;;  %1746 = vmatmul.mubr.msk.bf16.vlgmr.msra.gmra.mrb[8].mxu0 %vm571_vm4, %v680_v17 }
 0x473   : > { %1757 = vmatprep.mubr.msk.bf16.mxu0 %vm2022_vm2, %v2021_v6 }
 0x477   : > { %v786_v23 = vpop.f32.mrb[4].mxu0 }
 0x478   : > { %v792_v25 = vpack.c.bf16 %v786_v23, %v786_v23  ;;  %v1735_v26 = vpop.f32.mrb[5].mxu0  ;;  %v1158_v23 = vsel %vm636_vm5, %v567_v21, 0 }
 0x479   : > { %v789_v27 = vpop.f32.mrb[6].mxu0 }
 0x47a   : > { %v1736_v29 = vpop.f32.mrb[7].mxu0  ;;  %1740 = vmatmul.mubr.msk.bf16.vlgmr.msra.gmra.mrb[12].mxu1 %vm571_vm4, %v792_v25 }
 0x47b   : > { %1750 = vmatpush3.bf16.xpose.msra.mxu1 %v893_v28  ;;  %1751 = vmatprep.mubr.msk.bf16.mxu1 %vm2022_vm2, %v2021_v6 }
 0x47c   : > { %1761 = vmatprep.subr.bf16.mxu1 %v2021_v6 }
 0x482   : > { %1752 = vmatmul.mubr.msk.bf16.vlgmr.msra.gmra.mrb[16].mxu1 %vm571_vm4, %v886_v31 }
 0x483   : > { %1763 = vmatprep.mubr.msk.bf16.mxu1 %vm2022_vm2, %v2021_v6  ;;  %1762 = vmatpush3.bf16.msra.mxu1 %v1000_v61 }
 0x484   : > { %1773 = vmatprep.subr.bf16.mxu1 %v2021_v6 }
 0x545   : > { %v879_v32 = vpop.f32.mrb[8].mxu0 }
 0x546   : > { %v1747_v33 = vpop.f32.mrb[9].mxu0 }
 0x547   : > { %v882_v34 = vpop.f32.mrb[10].mxu0 }
 0x548   : > { %v1748_v35 = vpop.f32.mrb[11].mxu0 }
 0x54d   : > { %v833_v36 = vpop.f32.mrb[12].mxu1 }
 0x54e   : > { %v2289_v37 = vadd.f32 %v879_v32, %v833_v36  ;;  %v1741_v38 = vpop.f32.mrb[13].mxu1 }
 0x54f   : > { %v836_v39 = vpop.f32.mrb[14].mxu1 }
 0x550   : > { %v1742_v40 = vpop.f32.mrb[15].mxu1 }
 0x555   : > { %v929_v41 = vpop.f32.mrb[16].mxu1 }
 0x556   : > { %v930_v42 = vadd.f32 %v929_v41, %v2246_v30  ;;  %v1753_v43 = vpop.f32.mrb[17].mxu1 }
 0x557   : > { %v932_v44 = vpop.f32.mrb[18].mxu1 }
 0x558   : > { %v1754_v45 = vpop.f32.mrb[19].mxu1  ;;  %v935_v46 = vsel %vm571_vm4, %v930_v42, -inf }
 0x559   : > { %936 = vmax.xlane.f32.xlu1 %v935_v46 }
 0x56a   : > { %1045 = vrot.lane.b32.xlu1 %v2228_v22, %s2031_s20 }
 0x56e   : > { %1043 = vrot.lane.b32.xlu1 %v2232_v24, %s2032_s28 }
 0x5e6   : > { %v937_v47 = vpop.xlane.xlu1 %936 }
 0x5e7   : > { %v938_v48 = vsub.f32 %v930_v42, %v937_v47 }
 0x5e9   : > { %v939_v49 = vmul.f32 1.442695, %v938_v48 }
 0x5ea   : > { %v1046_v56 = vpop.permute.xlu1 %1045 }
 0x5eb   : > { %1907 = vpow2.f32 %v939_v49  ;;  %v1051_v58 = vsel %vm571_vm4, %v1046_v56, 0 }
 0x5ee   : > { %v1044_v59 = vpop.permute.xlu1 %1043 }
 0x5f5   : > { %v1908_v51 = vpop.eup %1907 }
 0x5f6   : > { %v941_v52 = vsel %vm571_vm4, %v1908_v51, 0.0 }
 0x5f7   : > { %942 = vadd.xlane.f32.xlu0 %v941_v52 }
 0x60d   : > { %947 = vrot.lane.b32.xlu0 %v2254_v50, %s2033_s18 }
 0x684   : > { %v943_v53 = vpop.xlane.xlu0 %942 }
 0x685   : > { %1909 = vrcp.f32 %v943_v53 }
 0x688   : > { %v948_v54 = vpop.permute.xlu0 %947 }
 0x689   : > { %v953_v22 = vsel %vm636_vm5, %v948_v54, 0 }
 0x68a   : > { %1756 = vmatpush3.bf16.msra.mxu0 %v953_v22  ;;  %v1893_v22 = vld [vmem:[%s2180_s10] sm:$0xff]  }
 0x68b   : > { %1767 = vmatprep.subr.bf16.mxu0 %v2021_v6 }
 0x68f   : > { %v1910_v24 = vpop.eup %1909 }
 0x690   : > { %v945_v55 = vmul.f32 %v1910_v24, %v1908_v51  ;;  %v1894_v24 = vld [vmem:[%s2180_s10 + $0x8] sm:$0xff]  }
 0x692   : > { %v946_v57 = vpack.c.bf16 %v945_v55, %v945_v55 }
 0x694   : > { %1758 = vmatmul.mubr.msk.bf16.vlgmr.msra.gmra.mrb[12].mxu0 %vm571_vm4, %v946_v57  ;;  %v1223_v57 = vsub.s32 4, %v2206_v9 }
 0x695   : > { %1768 = vmatpush3.bf16.xpose.msra.mxu0 %v1051_v58  ;;  %1769 = vmatprep.mubr.msk.bf16.mxu0 %vm2022_vm2, %v2021_v6  ;;  %v1228_v58 = vsub.s32 5, %v2206_v9 }
 0x696   : > { %1779 = vmatprep.subr.bf16.mxu0 %v2021_v6 }
 0x69c   : > { %1770 = vmatmul.mubr.msk.bf16.vlgmr.msra.gmra.mrb[16].mxu0 %vm571_vm4, %v1044_v59  ;;  %v1224_v59 = vrot.slane %v2210_v10, %v1223_v57 }
 0x69d   : > { %1781 = vmatprep.mubr.msk.bf16.mxu0 %vm2022_vm2, %v2021_v6  ;;  %1780 = vmatpush3.bf16.msra.mxu0 %v1158_v23 }
 0x69e   : > { %1793 = vmatprep.subr.bf16.mxu0 %v2021_v6 }
 0x767   : > { %v989_v62 = vpop.f32.mrb[12].mxu0 }
 0x768   : > { %v995_v63 = vpack.c.bf16 %v989_v62, %v989_v62  ;;  %v1759_v0 = vpop.f32.mrb[13].mxu0  ;;  %v1229_v62 = vrot.slane %v2210_v10, %v1228_v58 }
 0x769   : > { %v992_v1 = vpop.f32.mrb[14].mxu0 }
 0x76a   : > { %v1760_v2 = vpop.f32.mrb[15].mxu0  ;;  %1764 = vmatmul.mubr.msk.bf16.vlgmr.msra.gmra.mrb[20].mxu1 %vm571_vm4, %v995_v63 }
 0x76b   : > { %1775 = vmatprep.mubr.msk.bf16.mxu1 %vm2022_vm2, %v2021_v6  ;;  %v1895_v2 = vld [vmem:[%s2185_s19] sm:$0xff]  }
 0x76f   : > { %v1087_v3 = vpop.f32.mrb[16].mxu0 }
 0x770   : > { %v1088_v4 = vadd.f32 %v1087_v3, %v2246_v30  ;;  %v1771_v5 = vpop.f32.mrb[17].mxu0  ;;  %v1896_v3 = vld [vmem:[%s2185_s19 + $0x8] sm:$0xff]  }
 0x771   : > { %v1090_v7 = vpop.f32.mrb[18].mxu0  ;;  %v1898_v5 = vld [vmem:[%s2185_s19 + $0x18] sm:$0xff]  }
 0x772   : > { %v1772_v12 = vpop.f32.mrb[19].mxu0  ;;  %v1093_v13 = vsel %vm571_vm4, %v1088_v4, -inf  ;;  %v1238_v7 = vsub.s32 6, %v2206_v9 }
 0x773   : > { %1094 = vmax.xlane.f32.xlu0 %v1093_v13 }
 0x774   : > { %v1239_v12 = vrot.slane %v2210_v10, %v1238_v7 }
 0x789   : > { %1105 = vrot.lane.b32.xlu0 %v2254_v50, %s2034_s17 }
 0x800   : > { %v1095_v15 = vpop.xlane.xlu0 %1094 }
 0x801   : > { %v1096_v16 = vsub.f32 %v1088_v4, %v1095_v15  ;;  %v1897_v4 = vld [vmem:[%s2185_s19 + $0x10] sm:$0xff]  }
 0x803   : > { %v1097_v17 = vmul.f32 1.442695, %v1096_v16 }
 0x804   : > { %v1106_v18 = vpop.permute.xlu0 %1105 }
 0x805   : > { %1911 = vpow2.f32 %v1097_v17  ;;  %v1111_v19 = vsel %vm636_vm5, %v1106_v18, 0 }
 0x806   : > { %1774 = vmatpush3.bf16.msra.mxu1 %v1111_v19 }
 0x807   : > { %1785 = vmatprep.subr.bf16.mxu1 %v2021_v6 }
 0x80f   : > { %v1912_v30 = vpop.eup %1911 }
 0x810   : > { %v1099_v20 = vsel %vm571_vm4, %v1912_v30, 0.0 }
 0x811   : > { %1100 = vadd.xlane.f32.xlu1 %v1099_v20 }
 0x83d   : > { %v1036_v50 = vpop.f32.mrb[20].mxu1 }
 0x83e   : > { %v1042_v25 = vadd.f32 %v1036_v50, %v2289_v37  ;;  %v1765_v26 = vpop.f32.mrb[21].mxu1  ;;  %v1203_v37 = vsub.s32 3, %v2206_v9 }
 0x83f   : > { %v1039_v27 = vpop.f32.mrb[22].mxu1 }
 0x840   : > { %v1766_v28 = vpop.f32.mrb[23].mxu1  ;;  %v1204_v40 = vrot.slane %v2210_v10, %v1203_v37  ;;  %v2035_v37 = vmov 1.0  }
 0x89e   : > { %v1101_v29 = vpop.xlane.xlu1 %1100 }
 0x89f   : > { %1913 = vrcp.f32 %v1101_v29 }
 0x8a9   : > { %v1914_v31 = vpop.eup %1913 }
 0x8aa   : > { %v1103_v32 = vmul.f32 %v1914_v31, %v1912_v30 }
 0x8ac   : > { %v1104_v33 = vpack.c.bf16 %v1103_v32, %v1103_v32 }
 0x8ae   : > { %1776 = vmatmul.mubr.msk.bf16.vlgmr.msra.gmra.mrb[24].mxu1 %vm571_vm4, %v1104_v33 }
 0x8af   : > { %1789 = vmatprep.mubr.msk.bf16.mxu1 %vm2022_vm2, %v2021_v6  ;;  %1786 = vmatpush3.bf16.msra.mxu1 %v1893_v22 }
 0x8b0   : > { %1787 = vmatprep.subr.bf16.mxu1 %v2021_v6 }
 0x8b3   : > { %1788 = vmatpush3.bf16.msra.mxu1 %v1894_v24 }
 0x981   : > { %v1147_v34 = vpop.f32.mrb[24].mxu1 }
 0x982   : > { %v1153_v35 = vpack.c.bf16 %v1147_v34, %v1147_v34  ;;  %v1777_v36 = vpop.f32.mrb[25].mxu1 }
 0x983   : > { %v1150_v38 = vpop.f32.mrb[26].mxu1 }
 0x984   : > { %v1778_v39 = vpop.f32.mrb[27].mxu1  ;;  %1782 = vmatmul.mubr.msk.bf16.vlgmr.msra.gmra.mrb[20].mxu0 %vm571_vm4, %v1153_v35 }
 0x985   : > { %1801 = vmatprep.mubr.msk.bf16.mxu0 %vm2022_vm2, %v2021_v6  ;;  %1794 = vmatpush3.bf16.msra.mxu0 %v1895_v2 }
 0x986   : > { %1795 = vmatprep.subr.bf16.mxu0 %v2021_v6 }
 0x989   : > { %1796 = vmatpush3.bf16.msra.mxu0 %v1896_v3 }
 0x98a   : > { %1797 = vmatprep.subr.bf16.mxu0 %v2021_v6 }
 0x98d   : > { %1798 = vmatpush3.bf16.msra.mxu0 %v1897_v4 }
 0x98e   : > { %1799 = vmatprep.subr.bf16.mxu0 %v2021_v6 }
 0x991   : > { %1800 = vmatpush3.bf16.msra.mxu0 %v1898_v5 }
 0xa57   : > { %v1194_v41 = vpop.f32.mrb[20].mxu0 }
 0xa58   : > { %v1200_v42 = vadd.f32 %v1194_v41, %v1042_v25  ;;  %v1783_v43 = vpop.f32.mrb[21].mxu0 }
 0xa59   : > { %v1197_v44 = vpop.f32.mrb[22].mxu0 }
 0xa5a   : > { %v1205_v45 = vadd.f32 %v1204_v40, %v1200_v42  ;;  %v1784_v46 = vpop.f32.mrb[23].mxu0 }
 0xa5b   : > { %v1333_v46 = vsub.s32 7, %v2206_v9 }
 0xa5c   : > { %v1206_v47 = vadd.f32 %v1205_v45, %v2204_v8 }
 0xa5e   : > { %v1207_v48 = vsel %vm493_vm3, %v1206_v47, 0.0 }
 0xa5f   : > { %1208 = vadd.xlane.f32.xlu1 %v1207_v48 }
 0xaec   : > { %v1209_v49 = vpop.xlane.xlu1 %1208 }
 0xaed   : > { %v1211_v51 = vmul.f32 0.03125, %v1209_v49 }
 0xaef   : > { %v1212_v52 = vsub.f32 %v1206_v47, %v1211_v51  ;;  %v1334_v47 = vrot.slane %v2210_v10, %v1333_v46 }
 0xaf1   : > { %v1213_v53 = vmul.f32 %v1212_v52, %v1212_v52 }
 0xaf3   : > { %v1214_v54 = vsel %vm493_vm3, %v1213_v53, 0.0 }
 0xaf4   : > { %1215 = vadd.xlane.f32.xlu1 %v1214_v54 }
 0xb81   : > { %v1216_v55 = vpop.xlane.xlu1 %1215 }
 0xb82   : > { %v1217_v56 = vmul.f32 0.03125, %v1216_v55 }
 0xb84   : > { %v1218_v8 = vadd.f32 1e-05, %v1217_v56 }
 0xb86   : > { %1915 = vrsqrt.f32 %v1218_v8 }
 0xb90   : > { %v1916_v60 = vpop.eup %1915 }
 0xb91   : > { %v1220_v61 = vmul.f32 %v1916_v60, %v1212_v52  ;;  %v476_v60 = vld [vmem:[%s2190_s11 + $0x8] sm:$0x3] }
 0xb93   : > { %v1225_v63 = vmul.f32 %v1224_v59, %v1220_v61  ;;  %v1420_v61 = vrot.slane %v476_v60, %v539_v14 }
 0xb95   : > { %v1230_v0 = vadd.f32 %v1229_v62, %v1225_v63  ;;  %v1425_v63 = vrot.slane %v476_v60, %v545_v11 }
 0xb97   : > { %v1231_v1 = vpack.c.bf16 %v1230_v0, %v1230_v0 }
 0xb99   : > { %1790 = vmatmul.mubr.msk.bf16.vlgmr.msra.gmra.mrb[28].mxu1 %vm493_vm3, %v1231_v1 }
 0xc6c   : > { %v1289_v13 = vpop.f32.mrb[28].mxu1 }
 0xc6d   : > { %v1290_v15 = vadd.f32 %v1289_v13, %v1239_v12  ;;  %v1791_v16 = vpop.f32.mrb[29].mxu1 }
 0xc6e   : > { %v1292_v17 = vpop.f32.mrb[30].mxu1 }
 0xc6f   : > { %v1296_v18 = vmul.f32 0.70710677, %v1290_v15  ;;  %v1792_v19 = vpop.f32.mrb[31].mxu1  ;;  %v1295_v42 = vmul.f32 0.5, %v1290_v15 }
 0xc71   : > { %v1299_v30 = vand.u32 2147483647, %v1296_v18  ;;  %vm1297_vm6 = vcmp.lt.f32.partialorder %v1296_v18, 0.0 }
 0xc72   : > { %v1298_v40 = vsel %vm1297_vm6, -1.0, %v2035_v37 }
 0xc73   : > { %v1300_v20 = vmul.f32 0.3275911, %v1299_v30  ;;  %v1313_v23 = vsub.f32 0.0, %v1299_v30 }
 0xc75   : > { %v1301_v21 = vadd.f32 1.0, %v1300_v20  ;;  %v1314_v25 = vmul.f32 %v1313_v23, %v1299_v30 }
 0xc77   : > { %1917 = vrcp.f32 %v1301_v21  ;;  %v1315_v27 = vmul.f32 1.442695, %v1314_v25 }
 0xc79   : > { %1919 = vpow2.f32 %v1315_v27 }
 0xc81   : > { %v1918_v50 = vpop.eup %1917 }
 0xc82   : > { %v1304_v6 = vmul.f32 1.0614054, %v1918_v50 }
 0xc83   : > { %v1920_v36 = vpop.eup %1919 }
 0xc84   : > { %v1305_v26 = vadd.f32 -1.4531521, %v1304_v6 }
 0xc86   : > { %v1306_v28 = vmul.f32 %v1918_v50, %v1305_v26 }
 0xc88   : > { %v1307_v29 = vadd.f32 1.4214138, %v1306_v28 }
 0xc8a   : > { %v1308_v31 = vmul.f32 %v1918_v50, %v1307_v29 }
 0xc8c   : > { %v1309_v32 = vadd.f32 -0.28449672, %v1308_v31 }
 0xc8e   : > { %v1310_v33 = vmul.f32 %v1918_v50, %v1309_v32 }
 0xc90   : > { %v1311_v34 = vadd.f32 0.2548296, %v1310_v33 }
 0xc92   : > { %v1312_v35 = vmul.f32 %v1918_v50, %v1311_v34 }
 0xc94   : > { %v1317_v38 = vmul.f32 %v1920_v36, %v1312_v35 }
 0xc96   : > { %v1318_v39 = vsub.f32 1.0, %v1317_v38 }
 0xc98   : > { %v1319_v41 = vmul.f32 %v1318_v39, %v1298_v40 }
 0xc9a   : > { %v1320_v43 = vadd.f32 1.0, %v1319_v41 }
 0xc9c   : > { %v1321_v44 = vmul.f32 %v1320_v43, %v1295_v42 }
 0xc9e   : > { %v1322_v45 = vpack.c.bf16 %v1321_v44, %v1321_v44 }
 0xca0   : > { %1802 = vmatmul.mubr.msk.bf16.vlgmr.msra.gmra.mrb[24].mxu0 %vm1359_vm7, %v1322_v45 }
 0xd73   : > { %v1397_v48 = vpop.f32.mrb[24].mxu0 }
 0xd74   : > { %v1398_v49 = vadd.f32 %v1397_v48, %v1334_v47  ;;  %v1803_v51 = vpop.f32.mrb[25].mxu0 }
 0xd75   : > { %v1400_v52 = vpop.f32.mrb[26].mxu0 }
 0xd76   : > { %v1804_v53 = vpop.f32.mrb[27].mxu0  ;;  %v1403_v54 = vadd.f32 %v1398_v49, %v1230_v0 }
 0xd78   : > { %v1404_v22 = vsel %vm493_vm3, %v1403_v54, 0.0 }
 0xd79   : > { %1405 = vadd.xlane.f32.xlu1 %v1404_v22 }
 0xe06   : > { %v1406_v24 = vpop.xlane.xlu1 %1405 }
 0xe07   : > { %v1407_v55 = vmul.f32 0.03125, %v1406_v24 }
 0xe09   : > { %v1408_v56 = vsub.f32 %v1403_v54, %v1407_v55 }
 0xe0b   : > { %v1409_v8 = vmul.f32 %v1408_v56, %v1408_v56 }
 0xe0d   : > { %v1410_v57 = vsel %vm493_vm3, %v1409_v8, 0.0 }
 0xe0e   : > { %1411 = vadd.xlane.f32.xlu1 %v1410_v57 }
 0xe9b   : > { %v1412_v58 = vpop.xlane.xlu1 %1411 }
 0xe9c   : > { %v1413_v59 = vmul.f32 0.03125, %v1412_v58 }
 0xe9e   : > { %v1414_v10 = vadd.f32 1e-05, %v1413_v59 }
 0xea0   : > { %1921 = vrsqrt.f32 %v1414_v10 }
 0xea9   : > { %1430 = sbr.rel (%p1657_p1) target bundleno = 3762 (0xeb2), region = 64 }
 0xeaa   : > { %v1922_v62 = vpop.eup %1921 }
 0xeab   : > { %v1416_v0 = vmul.f32 %v1922_v62, %v1408_v56 }
 0xead   : > { %v1421_v1 = vmul.f32 %v1420_v61, %v1416_v0 }
 0xeaf   : > { %v1426_v2 = vadd.f32 %v1425_v63, %v1421_v1 }
 0xeb1   : > { %1431 = vst.msk [vmem:[%s2192_s25] sm:$0xff] %vm493_vm3, %v1426_v2 }
 0xeb2 PF: > { %p1658_p2 = scmp.ne.s32.totalorder %s2003_s12, 1 }
 0xeb3   : > { %v1438_v3 = vsel (!%p1658_p2), %vm493_vm3, %v1426_v2, 0.0  ;;  %v1659_v16 = vld [vmem:[%s2436_s8] ss:$0 sm:$0xff] (!%p1658_p2)  ;;  %v1660_v18 = vld [vmem:[%s2436_s8 + $0x1] ss:$0 sm:$0xff] (!%p1658_p2) }
 0xeb4   : > { %1435 = sbr.rel (%p1658_p2) target bundleno = 4077 (0xfed), region = 68  ;;  %1439 = vadd.xlane.f32.xlu0 (!%p1658_p2), %v1438_v3 }
 0xf41   : > { %v1440_v14 = vpop.xlane.xlu0 %1439 }
 0xf42   : > { %v1441_v9 = vmul.f32 0.03125, %v1440_v14 }
 0xf44   : > { %v1442_v11 = vsub.f32 %v1426_v2, %v1441_v9 }
 0xf46   : > { %v1443_v4 = vmul.f32 %v1442_v11, %v1442_v11 }
 0xf48   : > { %v1444_v5 = vsel %vm493_vm3, %v1443_v4, 0.0 }
 0xf49   : > { %1445 = vadd.xlane.f32.xlu0 %v1444_v5 }
 0xfd6   : > { %v1446_v7 = vpop.xlane.xlu0 %1445 }
 0xfd7   : > { %v1447_v12 = vmul.f32 0.03125, %v1446_v7 }
 0xfd9   : > { %v1448_v13 = vadd.f32 1e-05, %v1447_v12 }
 0xfdb   : > { %1923 = vrsqrt.f32 %v1448_v13 }
 0xfe5   : > { %v1924_v15 = vpop.eup %1923 }
 0xfe6   : > { %v1450_v17 = vmul.f32 %v1924_v15, %v1442_v11 }
 0xfe8   : > { %v1455_v19 = vmul.f32 %v1659_v16, %v1450_v17 }
 0xfea   : > { %v1460_v30 = vadd.f32 %v1660_v18, %v1455_v19 }
 0xfec   : > { %1461 = vst.msk [vmem:[%s2192_s25] sm:$0xff] %vm493_vm3, %v1460_v30 }
 0xfed PF: > { %s2465_s24 = sld [smem:[#allocation7_spill]]  ;;  %s1662_s9 = sshll.u32 %s2007_s13, 7 }
 0xfee   : > { %s2467_s15 = sld [smem:[#allocation17_spill]]  ;;  %s1476_s22 = sshll.u32 %s2192_s25, 4  ;;  %s1477_s22 = int_to_ptr.vmem [resolvable:$true] %s1476_s22 }
 0xfef   : > { %s1925_s23 = scalar_lea.vmem %s1477_s22, 128  ;;  %s2036_s20 = smov [#allocation3]  }
 0xff0   : > { %p1926_p4 = scmp.ne.s32.totalorder %s1477_s22, %s1925_s23  ;;  %s1929_s28 = sshll.u32 %s2036_s20, 4  ;;  %s1930_s28 = int_to_ptr.vmem [resolvable:$false] %s1929_s28 }
 0xff1   : > { %s1931_s18 = scalar_lea.vmem %s1930_s28, 256  ;;  %p1932_p7 = scmp.lt.s32.totalorder %s1477_s22, %s1930_s28 }
 0xff2   : > { %p1927_p5 = pnand %p1926_p4, %p2136_p3  ;;  %p1933_p8 = scmp.lt.s32.totalorder %s1931_s18, %s1925_s23 }
 0xff3   : > { %s2469_s27 = sand.u32 1, %s2465_s24  }
 0xff4   : > { %s2468_s21 = smov %s2467_s15  ;;  %s2378_s16 = scalar_lea.hbm %s2467_s15, %s1662_s9 }
 0xff5   : > { %s1463_s29 = scalar_lea.sflag [#allocation4], %s2469_s27  ;;  %p1928_p6 = pneg %p1927_p5 }
 0xff6   : > { %p1934_p10 = por %p1933_p8, %p1932_p7 }
 0xff8   : > { %p1935_p11 = pnand %p1934_p10, %p1928_p6 }
 0xffa   : > { %1938 = shalt.err (!%p1935_p11)
}
 0xffb   : > { %s1939_s13 = scalar_lea.hbm %s2378_s16, 128  ;;  %s1943_s10 = scalar_lea.hbm %s2468_s21, 256 }
 0xffc   : > { %p1940_p12 = scmp.ne.s32.totalorder %s2378_s16, %s1939_s13  ;;  %p1944_p1 = scmp.lt.u32.totalorder %s2378_s16, %s2468_s21 }
 0xffd   : > { %p1945_p2 = scmp.lt.u32.totalorder %s1943_s10, %s1939_s13  ;;  %p1947_p5 = scmp.lt.u32.totalorder %s1939_s13, %s2378_s16 }
 0xffe   : > { %p1941_p13 = pnand %p1940_p12, %p2136_p3 }
 0xfff   : > { %p1946_p4 = por %p1945_p2, %p1944_p1 }
0x1000   : > { %p1942_p0 = pneg %p1941_p13 }
0x1001   : > { %p1948_p6 = por %p1947_p5, %p1946_p4 }
0x1003   : > { %p1949_p7 = pnand %p1948_p6, %p1942_p0 }
0x1005   : > { %1952 = shalt.err (!%p1949_p7)
}
0x1006   : > { %1805 = dma.vmem_to_hbm [thread:$0]  (%p2136_p3), %s1477_s22, 128, %s2378_s16, %s1463_s29  }
0x1007 PF: > { %s2470_s19 = sld [smem:[#allocation11_spill]]  ;;  %s2471_s24 = sld [smem:[#allocation6_spill]] }
0x100d   : > { %p1811_p8 = scmp.ge.s32.totalorder %s2470_s19, 2  ;;  %s1488_s30 = sand.u32 1, %s2471_s24  }
0x100e   : > { %s1489_s14 = scalar_lea.sflag [#allocation4], %s1488_s30 }
0x100f   : > { %p1808_p10 = pnand %p1811_p8, %p2146_p9 }
0x1011   : > { %1986 = dma.done.wait (!%p1808_p10), %s1489_s14, 128  }
0x1012   : > { %1988 = vsyncadd (!%p1808_p10), %s1489_s14, 4294967168  ;;  %s22_s16 = sadd.s32 1, %s2470_s19   ;;  %s2473_s30 = sld [smem:[#allocation7_spill]] }
0x1013   : > { %p19_p11 = scmp.ge.s32.totalorder %s22_s16, 6   ;;  %s2474_s10 = sld [smem:[#allocation8_spill]] }
0x1014   : > { %s2475_s11 = sld [smem:[#allocation16_spill]]  ;;  %s2476_s12 = sld [smem:[#allocation9_spill]] }
0x1015   : > { %s2477_s13 = sld [smem:[#allocation10_spill]]  ;;  %s2478_s14 = sld [smem:[#allocation12_spill]] }
0x1016   : > { %s2479_s15 = sld [smem:[#allocation14_spill]]  ;;  %21 = sbr.rel (!%p19_p11) target bundleno = 7 (0x7), region = 121 }
0x101d   :  { %1494 = vsyncpa [#allocation4], 1 }
0x101e   :  { %1496 = vsyncpa [#allocation4 + $0x1], 1 }

</bundles_post_ra>
